<compile_context>
chip_gen: v6e
topology: v6e:2x2x1
jax: 0.10.0
libtpu: 0.0.40
codegen_flags: <defaults>
</compile_context>

<pallas_src>
import functools
import math

import jax
import jax.numpy as jnp
import numpy as np
from jax.experimental import pallas as pl
from jax.experimental.pallas import tpu as pltpu


LANES = 128
TILE_B = 32      # images per grid step (tunable; clamped for small batches)
SUB_B = 16       # in-kernel batch sub-tile (bounds vreg live ranges)


def _round_up(n, m):
    return ((n + m - 1) // m) * m


# ----------------------------------------------------------------------------
# One-time parameter packing (hoisted out of the forward pass).
# All matmul weights are lane-dense bf16; biases stay f32.
# ----------------------------------------------------------------------------
def pack_params(params):
    w1 = np.asarray(params["conv1_w"], np.float32)   # [6, 1, 5, 5]
    b1 = np.asarray(params["conv1_b"], np.float32)   # [6]
    w2 = np.asarray(params["conv2_w"], np.float32)   # [16, 6, 5, 5]
    b2 = np.asarray(params["conv2_b"], np.float32)   # [16]
    fw1 = np.asarray(params["fc1_w"], np.float32)    # [256, 120]
    fb1 = np.asarray(params["fc1_b"], np.float32)    # [120]
    fw2 = np.asarray(params["fc2_w"], np.float32)    # [120, 84]
    fb2 = np.asarray(params["fc2_b"], np.float32)    # [84]
    fw3 = np.asarray(params["fc3_w"], np.float32)    # [84, 10]
    fb3 = np.asarray(params["fc3_b"], np.float32)    # [10]

    # Stage 1 (conv1 + ReLU + pool) weights, indexed by pooled-row phase r and
    # conv-row pool phase pi.  K = a_local*128 + m*32 + col packs two input
    # row-blocks (a = u, u+1) and the row phase m; all 5 row taps (di) are
    # folded into K at pack time.  N = pj*128 + J*6 + c packs both pool-col
    # phases pj, the 12 pooled cols J and the 6 channels c.
    W1K = np.zeros((2, 2, 256, 256), np.float32)
    for r in range(2):
        for pi in range(2):
            for a_loc in range(2):
                for m in range(4):
                    di = 4 * a_loc + m - 2 * r - pi
                    if not (0 <= di <= 4):
                        continue
                    for col in range(28):
                        for pj in range(2):
                            for J in range(12):
                                dj = col - 2 * J - pj
                                if not (0 <= dj <= 4):
                                    continue
                                k = a_loc * 128 + m * 32 + col
                                n0 = pj * 128 + J * 6
                                W1K[r, pi, k, n0:n0 + 6] = w1[:, 0, di, dj]
    b1p = np.zeros((1, LANES), np.float32)
    b1p[0, :72] = np.tile(b1, 12)                    # lane = J*6 + c

    # Stage 2 (conv2 + ReLU + pool) Toeplitz, one slab per row tap di.
    # K = J*6 + ci (pool1 col / in-channel);  N = pj2*128 + Q*16 + co.
    T2 = np.zeros((5, LANES, 256), np.float32)
    for di in range(5):
        for J in range(12):
            for ci in range(6):
                for pj in range(2):
                    for Q in range(4):
                        dj = J - 2 * Q - pj
                        if not (0 <= dj <= 4):
                            continue
                        n0 = pj * 128 + Q * 16
                        T2[di, J * 6 + ci, n0:n0 + 16] = w2[:, ci, di, dj]
    b2p = np.zeros((1, LANES), np.float32)
    b2p[0, :64] = np.tile(b2, 4)                     # lane = Q*16 + co

    # fc1 split over pooled row P (encodes PyTorch's (c, h, w) flatten order).
    Wf1 = np.zeros((4, LANES, LANES), np.float32)
    for P in range(4):
        for Q in range(4):
            for c in range(16):
                Wf1[P, Q * 16 + c, :120] = fw1[c * 16 + P * 4 + Q, :]
    fb1p = np.zeros((1, LANES), np.float32)
    fb1p[0, :120] = fb1

    Wf2 = np.zeros((LANES, LANES), np.float32)
    Wf2[:120, :84] = fw2
    fb2p = np.zeros((1, LANES), np.float32)
    fb2p[0, :84] = fb2

    Wf3 = np.zeros((LANES, LANES), np.float32)
    Wf3[:84, :10] = fw3
    fb3p = np.zeros((1, LANES), np.float32)
    fb3p[0, :10] = fb3

    bf = jnp.bfloat16
    return dict(
        W1K=jnp.asarray(W1K).astype(bf), b1=jnp.asarray(b1p),
        T2=jnp.asarray(T2).astype(bf), b2=jnp.asarray(b2p),
        Wf1=jnp.asarray(Wf1).astype(bf), fb1=jnp.asarray(fb1p),
        Wf2=jnp.asarray(Wf2).astype(bf), fb2=jnp.asarray(fb2p),
        Wf3=jnp.asarray(Wf3).astype(bf), fb3=jnp.asarray(fb3p),
    )


# ----------------------------------------------------------------------------
# The fused kernel: conv1+ReLU+pool, conv2+ReLU+pool, fc1+fc2+fc3.
# ----------------------------------------------------------------------------
def _lenet5_kernel(x_ref, w1k_ref, b1_ref, t2_ref, b2_ref,
                   wf1_ref, fb1_ref, wf2_ref, fb2_ref, wf3_ref, fb3_ref,
                   o_ref, p2_ref, *, tile_b, sub_b):
    f32 = jnp.float32
    bf16 = jnp.bfloat16
    sb = sub_b
    nsub = tile_b // sb

    b1 = b1_ref[...]                                  # [1, 128] f32
    b2 = b2_ref[...]                                  # [1, 128] f32

    for t in range(nsub):
        # --- stage 1: conv1 (1->6, 5x5) + ReLU + 2x2 max-pool ---------------
        # rows of lhs1 = (pooled-row-block u, batch);  lanes = full K=256.
        lhs1 = x_ref[:, t * sb:(t + 1) * sb, :].reshape(6 * sb, 256)   # bf16
        pooled1 = []
        for r in range(2):
            best = None
            for pi in range(2):
                y = jnp.dot(lhs1, w1k_ref[r, pi], preferred_element_type=f32)
                cand = jnp.maximum(y[:, :LANES], y[:, LANES:])   # max over pj
                best = cand if best is None else jnp.maximum(best, cand)
            p1 = jnp.maximum(best + b1, 0.0)          # [6*sb, 128] f32
            pooled1.append(p1.reshape(6, sb, LANES))  # pool1 row = 2u + r

        # --- stage 2: conv2 (6->16, 5x5) + ReLU + 2x2 max-pool --------------
        best2 = None
        for pi in range(2):
            acc = None
            for di in range(5):
                s = pi + di
                r2, q = s % 2, s // 2
                lhs2 = pooled1[r2][q:q + 4].reshape(4 * sb, LANES).astype(bf16)
                part = jnp.dot(lhs2, t2_ref[di], preferred_element_type=f32)
                acc = part if acc is None else acc + part
            cand = jnp.maximum(acc[:, :LANES], acc[:, LANES:])   # max over pj2
            best2 = cand if best2 is None else jnp.maximum(best2, cand)
        p2 = jnp.maximum(best2 + b2, 0.0)             # [4*sb, 128] f32
        p2_ref[:, t * sb:(t + 1) * sb, :] = p2.reshape(4, sb, LANES)

    # --- stage 3: fc1 + fc2 + fc3 over the full batch tile ------------------
    h = None
    for P in range(4):
        part = jnp.dot(p2_ref[P].astype(bf16), wf1_ref[P],
                       preferred_element_type=f32)
        h = part if h is None else h + part
    h = jnp.maximum(h + fb1_ref[...], 0.0)
    h = jnp.maximum(jnp.dot(h.astype(bf16), wf2_ref[...],
                            preferred_element_type=f32) + fb2_ref[...], 0.0)
    out = jnp.dot(h.astype(bf16), wf3_ref[...],
                  preferred_element_type=f32) + fb3_ref[...]
    o_ref[...] = out.astype(o_ref.dtype)


# ----------------------------------------------------------------------------
# Host wrapper.
# ----------------------------------------------------------------------------
def _prep_input(x):
    """NCHW [B,1,28,28] -> lane-dense sliding row-window blocks [6, B, 256].

    For window u: lane k < 128 holds input row 4u + k//32, col k%32;
                  lane k >= 128 holds input row 4(u+1) + (k-128)//32, same col.
    Cast to bf16 host-side (halves input DMA; the kernel would cast anyway).
    """
    B = x.shape[0]
    x = x[:, 0]                                            # [B, 28, 28]
    x = jnp.pad(x, ((0, 0), (0, 0), (0, 4)))               # [B, 28, 32]
    x = x.reshape(B, 7, 128)                               # lane = m*32 + col
    xw = jnp.concatenate([x[:, 0:6, :], x[:, 1:7, :]], axis=-1)   # [B, 6, 256]
    return jnp.transpose(xw, (1, 0, 2)).astype(jnp.bfloat16)      # [6, B, 256]


def _const_spec(shape):
    zeros = (0,) * len(shape)
    return pl.BlockSpec(shape, lambda i, _z=zeros: _z)


def lenet5_forward(packed, x, *, tile_b=TILE_B, sub_b=SUB_B):
    assert x.shape[1:] == (1, 28, 28), x.shape
    b = x.shape[0]
    tb = min(tile_b, _round_up(b, 8))
    sb = sub_b if tb % sub_b == 0 else tb
    bp = _round_up(b, tb)

    xr = _prep_input(x.astype(jnp.float32))                # [6, b, 256] bf16
    if bp != b:
        xr = jnp.pad(xr, ((0, 0), (0, bp - b), (0, 0)))

    out = pl.pallas_call(
        functools.partial(_lenet5_kernel, tile_b=tb, sub_b=sb),
        out_shape=jax.ShapeDtypeStruct((bp, LANES), jnp.float32),
        grid=(bp // tb,),
        in_specs=[
            pl.BlockSpec((6, tb, 256), lambda i: (0, i, 0)),      # input
            _const_spec((2, 2, 256, 256)), _const_spec((1, LANES)),   # conv1
            _const_spec((5, LANES, 256)), _const_spec((1, LANES)),    # conv2
            _const_spec((4, LANES, LANES)), _const_spec((1, LANES)),  # fc1
            _const_spec((LANES, LANES)), _const_spec((1, LANES)),     # fc2
            _const_spec((LANES, LANES)), _const_spec((1, LANES)),     # fc3
        ],
        out_specs=pl.BlockSpec((tb, LANES), lambda i: (i, 0)),
        scratch_shapes=[pltpu.VMEM((4, tb, LANES), jnp.float32)],
        compiler_params=pltpu.CompilerParams(
            dimension_semantics=("parallel",),
            vmem_limit_bytes=32 * 1024 * 1024,
        ),
    )(xr, packed["W1K"], packed["b1"], packed["T2"], packed["b2"],
      packed["Wf1"], packed["fb1"], packed["Wf2"], packed["fb2"],
      packed["Wf3"], packed["fb3"])
    return out[:b, :10]


# ----------------------------------------------------------------------------
# Pure-JAX reference (NCHW, same math as the PyTorch module).
# operand_dtype=bf16 mimics the kernel's bf16 MXU operands (f32 accumulation).
# ----------------------------------------------------------------------------
def lenet5_reference(params, x, *, operand_dtype=None):
    cast = (lambda a: a.astype(operand_dtype)) if operand_dtype else (lambda a: a)
    prec = jax.lax.Precision.HIGHEST

    def conv_relu(x, w, b):
        y = jax.lax.conv_general_dilated(
            cast(x), cast(w), window_strides=(1, 1), padding="VALID",
            dimension_numbers=("NCHW", "OIHW", "NCHW"),
            preferred_element_type=jnp.float32, precision=prec)
        return jnp.maximum(y + b[None, :, None, None], 0.0)

    def pool(x):
        B, C, H, W = x.shape
        return x.reshape(B, C, H // 2, 2, W // 2, 2).max(axis=(3, 5))

    def linear(x, w, b):
        return jnp.dot(cast(x), cast(w), preferred_element_type=jnp.float32,
                       precision=prec) + b

    x = pool(conv_relu(x, params["conv1_w"], params["conv1_b"]))
    x = pool(conv_relu(x, params["conv2_w"], params["conv2_b"]))
    x = x.reshape(x.shape[0], -1)
    x = jnp.maximum(linear(x, params["fc1_w"], params["fc1_b"]), 0.0)
    x = jnp.maximum(linear(x, params["fc2_w"], params["fc2_b"]), 0.0)
    return linear(x, params["fc3_w"], params["fc3_b"])


# ----------------------------------------------------------------------------
# Deterministic parameter init (PyTorch-default-style uniform bounds).
# ----------------------------------------------------------------------------
def init_params(key):
    def u(k, shape, fan_in):
        bound = 1.0 / math.sqrt(fan_in)
        return jax.random.uniform(k, shape, jnp.float32, -bound, bound)

    ks = jax.random.split(key, 10)
    return {
        "conv1_w": u(ks[0], (6, 1, 5, 5), 1 * 5 * 5),
        "conv1_b": u(ks[1], (6,), 1 * 5 * 5),
        "conv2_w": u(ks[2], (16, 6, 5, 5), 6 * 5 * 5),
        "conv2_b": u(ks[3], (16,), 6 * 5 * 5),
        "fc1_w": u(ks[4], (256, 120), 256),
        "fc1_b": u(ks[5], (120,), 256),
        "fc2_w": u(ks[6], (120, 84), 120),
        "fc2_b": u(ks[7], (84,), 120),
        "fc3_w": u(ks[8], (84, 10), 84),
        "fc3_b": u(ks[9], (10,), 84),
    }


if __name__ == "__main__":
    key = jax.random.PRNGKey(0)
    pkey, xkey = jax.random.split(key)
    params = init_params(pkey)
    packed = pack_params(params)        # one-time, hoisted weight packing

    # LeNet-5 architecture fixes the input at 1x28x28 (fc1 expects 16*4*4).
    x = jax.random.normal(xkey, (2, 1, 28, 28), dtype=jnp.float32)

    out = jax.block_until_ready(jax.jit(lenet5_forward)(packed, x))
    assert out.shape == (2, 10), out.shape

    ref_bf16 = lenet5_reference(params, x, operand_dtype=jnp.bfloat16)
    ref_f32 = lenet5_reference(params, x)
    err_exact = float(jnp.max(jnp.abs(out - ref_bf16)))   # packing/layout check
    err_quant = float(jnp.max(jnp.abs(out - ref_f32)))    # bf16 quantization
    assert err_exact < 2e-3, ("bf16-matched mismatch", err_exact)
    assert err_quant < 6e-2, ("f32 sanity mismatch", err_quant)
    print("KERNEL_OK")
</pallas_src>

<mosaic_0001>
module attributes {stable_mosaic.version = 11 : i64} {
  func.func @_lenet5_kernel(%arg0: i32, %arg1: memref<6x8x256xbf16, #tpu.memory_space<vmem>>, %arg2: memref<2x2x256x256xbf16, #tpu.memory_space<vmem>>, %arg3: memref<1x128xf32, #tpu.memory_space<vmem>>, %arg4: memref<5x128x256xbf16, #tpu.memory_space<vmem>>, %arg5: memref<1x128xf32, #tpu.memory_space<vmem>>, %arg6: memref<4x128x128xbf16, #tpu.memory_space<vmem>>, %arg7: memref<1x128xf32, #tpu.memory_space<vmem>>, %arg8: memref<128x128xbf16, #tpu.memory_space<vmem>>, %arg9: memref<1x128xf32, #tpu.memory_space<vmem>>, %arg10: memref<128x128xbf16, #tpu.memory_space<vmem>>, %arg11: memref<1x128xf32, #tpu.memory_space<vmem>>, %arg12: memref<8x128xf32, #tpu.memory_space<vmem>>, %arg13: memref<4x8x128xf32, #tpu.memory_space<vmem>>) attributes {dimension_semantics = [#tpu.dimension_semantics<parallel>], iteration_bounds = array<i64: 1>, scalar_prefetch = 0 : i64, scratch_operands = 1 : i64, tpu.core_type = #tpu.core_type<tc>, window_params = [{transform_indices = @transform_0, window_bounds = array<i64: 6, 8, 256>}, {pipeline_mode = #tpu.pipeline_mode<synchronous>, transform_indices = @transform_1, window_bounds = array<i64: 2, 2, 256, 256>}, {pipeline_mode = #tpu.pipeline_mode<synchronous>, transform_indices = @transform_2, window_bounds = array<i64: 1, 128>}, {pipeline_mode = #tpu.pipeline_mode<synchronous>, transform_indices = @transform_3, window_bounds = array<i64: 5, 128, 256>}, {pipeline_mode = #tpu.pipeline_mode<synchronous>, transform_indices = @transform_4, window_bounds = array<i64: 1, 128>}, {pipeline_mode = #tpu.pipeline_mode<synchronous>, transform_indices = @transform_5, window_bounds = array<i64: 4, 128, 128>}, {pipeline_mode = #tpu.pipeline_mode<synchronous>, transform_indices = @transform_6, window_bounds = array<i64: 1, 128>}, {pipeline_mode = #tpu.pipeline_mode<synchronous>, transform_indices = @transform_7, window_bounds = array<i64: 128, 128>}, {pipeline_mode = #tpu.pipeline_mode<synchronous>, transform_indices = @transform_8, window_bounds = array<i64: 1, 128>}, {pipeline_mode = #tpu.pipeline_mode<synchronous>, transform_indices = @transform_9, window_bounds = array<i64: 128, 128>}, {pipeline_mode = #tpu.pipeline_mode<synchronous>, transform_indices = @transform_10, window_bounds = array<i64: 1, 128>}, {transform_indices = @transform_11, window_bounds = array<i64: 8, 128>}]} {
    %c0 = arith.constant 0 : index
    %c0_0 = arith.constant 0 : index
    %0 = vector.load %arg3[%c0, %c0_0] : memref<1x128xf32, #tpu.memory_space<vmem>>, vector<1x128xf32>
    %c0_1 = arith.constant 0 : index
    %c0_2 = arith.constant 0 : index
    %1 = vector.load %arg5[%c0_1, %c0_2] : memref<1x128xf32, #tpu.memory_space<vmem>>, vector<1x128xf32>
    %c0_3 = arith.constant 0 : index
    %c0_4 = arith.constant 0 : index
    %c0_5 = arith.constant 0 : index
    %2 = vector.load %arg1[%c0_3, %c0_4, %c0_5] : memref<6x8x256xbf16, #tpu.memory_space<vmem>>, vector<6x8x256xbf16>
    %3 = vector.shape_cast %2 : vector<6x8x256xbf16> to vector<48x256xbf16>
    %c0_6 = arith.constant 0 : index
    %c0_7 = arith.constant 0 : index
    %c0_8 = arith.constant 0 : index
    %c0_9 = arith.constant 0 : index
    %4 = vector.load %arg2[%c0_6, %c0_7, %c0_8, %c0_9] : memref<2x2x256x256xbf16, #tpu.memory_space<vmem>>, vector<1x1x256x256xbf16>
    %5 = vector.shape_cast %4 : vector<1x1x256x256xbf16> to vector<256x256xbf16>
    %cst = arith.constant dense<0.000000e+00> : vector<48x256xf32>
    %6 = tpu.matmul %3, %5, %cst {dimension_numbers = #tpu.dot_dimension_numbers<[1], [0], [0], [1], [0, 0, 1, 1], [], []>} : vector<48x256xbf16>, vector<256x256xbf16>, vector<48x256xf32> -> vector<48x256xf32>
    %7 = vector.extract_strided_slice %6 {offsets = [0, 0], sizes = [48, 128], strides = [1, 1]} : vector<48x256xf32> to vector<48x128xf32>
    %8 = vector.extract_strided_slice %6 {offsets = [0, 128], sizes = [48, 128], strides = [1, 1]} : vector<48x256xf32> to vector<48x128xf32>
    %9 = arith.maximumf %7, %8 : vector<48x128xf32>
    %c0_10 = arith.constant 0 : index
    %c1 = arith.constant 1 : index
    %c0_11 = arith.constant 0 : index
    %c0_12 = arith.constant 0 : index
    %10 = vector.load %arg2[%c0_10, %c1, %c0_11, %c0_12] : memref<2x2x256x256xbf16, #tpu.memory_space<vmem>>, vector<1x1x256x256xbf16>
    %11 = vector.shape_cast %10 : vector<1x1x256x256xbf16> to vector<256x256xbf16>
    %cst_13 = arith.constant dense<0.000000e+00> : vector<48x256xf32>
    %12 = tpu.matmul %3, %11, %cst_13 {dimension_numbers = #tpu.dot_dimension_numbers<[1], [0], [0], [1], [0, 0, 1, 1], [], []>} : vector<48x256xbf16>, vector<256x256xbf16>, vector<48x256xf32> -> vector<48x256xf32>
    %13 = vector.extract_strided_slice %12 {offsets = [0, 0], sizes = [48, 128], strides = [1, 1]} : vector<48x256xf32> to vector<48x128xf32>
    %14 = vector.extract_strided_slice %12 {offsets = [0, 128], sizes = [48, 128], strides = [1, 1]} : vector<48x256xf32> to vector<48x128xf32>
    %15 = arith.maximumf %13, %14 : vector<48x128xf32>
    %16 = arith.maximumf %9, %15 : vector<48x128xf32>
    %17 = vector.broadcast %0 : vector<1x128xf32> to vector<48x128xf32>
    %18 = arith.addf %16, %17 : vector<48x128xf32>
    %cst_14 = arith.constant 0.000000e+00 : f32
    %19 = vector.broadcast %cst_14 : f32 to vector<48x128xf32>
    %20 = arith.maximumf %18, %19 : vector<48x128xf32>
    %21 = vector.shape_cast %20 : vector<48x128xf32> to vector<6x8x128xf32>
    %c1_15 = arith.constant 1 : index
    %c0_16 = arith.constant 0 : index
    %c0_17 = arith.constant 0 : index
    %c0_18 = arith.constant 0 : index
    %22 = vector.load %arg2[%c1_15, %c0_16, %c0_17, %c0_18] : memref<2x2x256x256xbf16, #tpu.memory_space<vmem>>, vector<1x1x256x256xbf16>
    %23 = vector.shape_cast %22 : vector<1x1x256x256xbf16> to vector<256x256xbf16>
    %cst_19 = arith.constant dense<0.000000e+00> : vector<48x256xf32>
    %24 = tpu.matmul %3, %23, %cst_19 {dimension_numbers = #tpu.dot_dimension_numbers<[1], [0], [0], [1], [0, 0, 1, 1], [], []>} : vector<48x256xbf16>, vector<256x256xbf16>, vector<48x256xf32> -> vector<48x256xf32>
    %25 = vector.extract_strided_slice %24 {offsets = [0, 0], sizes = [48, 128], strides = [1, 1]} : vector<48x256xf32> to vector<48x128xf32>
    %26 = vector.extract_strided_slice %24 {offsets = [0, 128], sizes = [48, 128], strides = [1, 1]} : vector<48x256xf32> to vector<48x128xf32>
    %27 = arith.maximumf %25, %26 : vector<48x128xf32>
    %c1_20 = arith.constant 1 : index
    %c1_21 = arith.constant 1 : index
    %c0_22 = arith.constant 0 : index
    %c0_23 = arith.constant 0 : index
    %28 = vector.load %arg2[%c1_20, %c1_21, %c0_22, %c0_23] : memref<2x2x256x256xbf16, #tpu.memory_space<vmem>>, vector<1x1x256x256xbf16>
    %29 = vector.shape_cast %28 : vector<1x1x256x256xbf16> to vector<256x256xbf16>
    %cst_24 = arith.constant dense<0.000000e+00> : vector<48x256xf32>
    %30 = tpu.matmul %3, %29, %cst_24 {dimension_numbers = #tpu.dot_dimension_numbers<[1], [0], [0], [1], [0, 0, 1, 1], [], []>} : vector<48x256xbf16>, vector<256x256xbf16>, vector<48x256xf32> -> vector<48x256xf32>
    %31 = vector.extract_strided_slice %30 {offsets = [0, 0], sizes = [48, 128], strides = [1, 1]} : vector<48x256xf32> to vector<48x128xf32>
    %32 = vector.extract_strided_slice %30 {offsets = [0, 128], sizes = [48, 128], strides = [1, 1]} : vector<48x256xf32> to vector<48x128xf32>
    %33 = arith.maximumf %31, %32 : vector<48x128xf32>
    %34 = arith.maximumf %27, %33 : vector<48x128xf32>
    %35 = vector.broadcast %0 : vector<1x128xf32> to vector<48x128xf32>
    %36 = arith.addf %34, %35 : vector<48x128xf32>
    %cst_25 = arith.constant 0.000000e+00 : f32
    %37 = vector.broadcast %cst_25 : f32 to vector<48x128xf32>
    %38 = arith.maximumf %36, %37 : vector<48x128xf32>
    %39 = vector.shape_cast %38 : vector<48x128xf32> to vector<6x8x128xf32>
    %40 = vector.extract_strided_slice %21 {offsets = [0, 0, 0], sizes = [4, 8, 128], strides = [1, 1, 1]} : vector<6x8x128xf32> to vector<4x8x128xf32>
    %41 = vector.shape_cast %40 : vector<4x8x128xf32> to vector<32x128xf32>
    %42 = arith.truncf %41 : vector<32x128xf32> to vector<32x128xbf16>
    %c0_26 = arith.constant 0 : index
    %c0_27 = arith.constant 0 : index
    %c0_28 = arith.constant 0 : index
    %43 = vector.load %arg4[%c0_26, %c0_27, %c0_28] : memref<5x128x256xbf16, #tpu.memory_space<vmem>>, vector<1x128x256xbf16>
    %44 = vector.shape_cast %43 : vector<1x128x256xbf16> to vector<128x256xbf16>
    %cst_29 = arith.constant dense<0.000000e+00> : vector<32x256xf32>
    %45 = tpu.matmul %42, %44, %cst_29 {dimension_numbers = #tpu.dot_dimension_numbers<[1], [0], [0], [1], [0, 0, 1, 1], [], []>} : vector<32x128xbf16>, vector<128x256xbf16>, vector<32x256xf32> -> vector<32x256xf32>
    %46 = vector.extract_strided_slice %39 {offsets = [0, 0, 0], sizes = [4, 8, 128], strides = [1, 1, 1]} : vector<6x8x128xf32> to vector<4x8x128xf32>
    %47 = vector.shape_cast %46 : vector<4x8x128xf32> to vector<32x128xf32>
    %48 = arith.truncf %47 : vector<32x128xf32> to vector<32x128xbf16>
    %c1_30 = arith.constant 1 : index
    %c0_31 = arith.constant 0 : index
    %c0_32 = arith.constant 0 : index
    %49 = vector.load %arg4[%c1_30, %c0_31, %c0_32] : memref<5x128x256xbf16, #tpu.memory_space<vmem>>, vector<1x128x256xbf16>
    %50 = vector.shape_cast %49 : vector<1x128x256xbf16> to vector<128x256xbf16>
    %cst_33 = arith.constant dense<0.000000e+00> : vector<32x256xf32>
    %51 = tpu.matmul %48, %50, %cst_33 {dimension_numbers = #tpu.dot_dimension_numbers<[1], [0], [0], [1], [0, 0, 1, 1], [], []>} : vector<32x128xbf16>, vector<128x256xbf16>, vector<32x256xf32> -> vector<32x256xf32>
    %52 = arith.addf %45, %51 : vector<32x256xf32>
    %53 = vector.extract_strided_slice %21 {offsets = [1, 0, 0], sizes = [4, 8, 128], strides = [1, 1, 1]} : vector<6x8x128xf32> to vector<4x8x128xf32>
    %54 = vector.shape_cast %53 : vector<4x8x128xf32> to vector<32x128xf32>
    %55 = arith.truncf %54 : vector<32x128xf32> to vector<32x128xbf16>
    %c2 = arith.constant 2 : index
    %c0_34 = arith.constant 0 : index
    %c0_35 = arith.constant 0 : index
    %56 = vector.load %arg4[%c2, %c0_34, %c0_35] : memref<5x128x256xbf16, #tpu.memory_space<vmem>>, vector<1x128x256xbf16>
    %57 = vector.shape_cast %56 : vector<1x128x256xbf16> to vector<128x256xbf16>
    %cst_36 = arith.constant dense<0.000000e+00> : vector<32x256xf32>
    %58 = tpu.matmul %55, %57, %cst_36 {dimension_numbers = #tpu.dot_dimension_numbers<[1], [0], [0], [1], [0, 0, 1, 1], [], []>} : vector<32x128xbf16>, vector<128x256xbf16>, vector<32x256xf32> -> vector<32x256xf32>
    %59 = arith.addf %52, %58 : vector<32x256xf32>
    %60 = vector.extract_strided_slice %39 {offsets = [1, 0, 0], sizes = [4, 8, 128], strides = [1, 1, 1]} : vector<6x8x128xf32> to vector<4x8x128xf32>
    %61 = vector.shape_cast %60 : vector<4x8x128xf32> to vector<32x128xf32>
    %62 = arith.truncf %61 : vector<32x128xf32> to vector<32x128xbf16>
    %c3 = arith.constant 3 : index
    %c0_37 = arith.constant 0 : index
    %c0_38 = arith.constant 0 : index
    %63 = vector.load %arg4[%c3, %c0_37, %c0_38] : memref<5x128x256xbf16, #tpu.memory_space<vmem>>, vector<1x128x256xbf16>
    %64 = vector.shape_cast %63 : vector<1x128x256xbf16> to vector<128x256xbf16>
    %cst_39 = arith.constant dense<0.000000e+00> : vector<32x256xf32>
    %65 = tpu.matmul %62, %64, %cst_39 {dimension_numbers = #tpu.dot_dimension_numbers<[1], [0], [0], [1], [0, 0, 1, 1], [], []>} : vector<32x128xbf16>, vector<128x256xbf16>, vector<32x256xf32> -> vector<32x256xf32>
    %66 = arith.addf %59, %65 : vector<32x256xf32>
    %67 = vector.extract_strided_slice %21 {offsets = [2, 0, 0], sizes = [4, 8, 128], strides = [1, 1, 1]} : vector<6x8x128xf32> to vector<4x8x128xf32>
    %68 = vector.shape_cast %67 : vector<4x8x128xf32> to vector<32x128xf32>
    %69 = arith.truncf %68 : vector<32x128xf32> to vector<32x128xbf16>
    %c4 = arith.constant 4 : index
    %c0_40 = arith.constant 0 : index
    %c0_41 = arith.constant 0 : index
    %70 = vector.load %arg4[%c4, %c0_40, %c0_41] : memref<5x128x256xbf16, #tpu.memory_space<vmem>>, vector<1x128x256xbf16>
    %71 = vector.shape_cast %70 : vector<1x128x256xbf16> to vector<128x256xbf16>
    %cst_42 = arith.constant dense<0.000000e+00> : vector<32x256xf32>
    %72 = tpu.matmul %69, %71, %cst_42 {dimension_numbers = #tpu.dot_dimension_numbers<[1], [0], [0], [1], [0, 0, 1, 1], [], []>} : vector<32x128xbf16>, vector<128x256xbf16>, vector<32x256xf32> -> vector<32x256xf32>
    %73 = arith.addf %66, %72 : vector<32x256xf32>
    %74 = vector.extract_strided_slice %73 {offsets = [0, 0], sizes = [32, 128], strides = [1, 1]} : vector<32x256xf32> to vector<32x128xf32>
    %75 = vector.extract_strided_slice %73 {offsets = [0, 128], sizes = [32, 128], strides = [1, 1]} : vector<32x256xf32> to vector<32x128xf32>
    %76 = arith.maximumf %74, %75 : vector<32x128xf32>
    %77 = vector.extract_strided_slice %39 {offsets = [0, 0, 0], sizes = [4, 8, 128], strides = [1, 1, 1]} : vector<6x8x128xf32> to vector<4x8x128xf32>
    %78 = vector.shape_cast %77 : vector<4x8x128xf32> to vector<32x128xf32>
    %79 = arith.truncf %78 : vector<32x128xf32> to vector<32x128xbf16>
    %c0_43 = arith.constant 0 : index
    %c0_44 = arith.constant 0 : index
    %c0_45 = arith.constant 0 : index
    %80 = vector.load %arg4[%c0_43, %c0_44, %c0_45] : memref<5x128x256xbf16, #tpu.memory_space<vmem>>, vector<1x128x256xbf16>
    %81 = vector.shape_cast %80 : vector<1x128x256xbf16> to vector<128x256xbf16>
    %cst_46 = arith.constant dense<0.000000e+00> : vector<32x256xf32>
    %82 = tpu.matmul %79, %81, %cst_46 {dimension_numbers = #tpu.dot_dimension_numbers<[1], [0], [0], [1], [0, 0, 1, 1], [], []>} : vector<32x128xbf16>, vector<128x256xbf16>, vector<32x256xf32> -> vector<32x256xf32>
    %83 = vector.extract_strided_slice %21 {offsets = [1, 0, 0], sizes = [4, 8, 128], strides = [1, 1, 1]} : vector<6x8x128xf32> to vector<4x8x128xf32>
    %84 = vector.shape_cast %83 : vector<4x8x128xf32> to vector<32x128xf32>
    %85 = arith.truncf %84 : vector<32x128xf32> to vector<32x128xbf16>
    %c1_47 = arith.constant 1 : index
    %c0_48 = arith.constant 0 : index
    %c0_49 = arith.constant 0 : index
    %86 = vector.load %arg4[%c1_47, %c0_48, %c0_49] : memref<5x128x256xbf16, #tpu.memory_space<vmem>>, vector<1x128x256xbf16>
    %87 = vector.shape_cast %86 : vector<1x128x256xbf16> to vector<128x256xbf16>
    %cst_50 = arith.constant dense<0.000000e+00> : vector<32x256xf32>
    %88 = tpu.matmul %85, %87, %cst_50 {dimension_numbers = #tpu.dot_dimension_numbers<[1], [0], [0], [1], [0, 0, 1, 1], [], []>} : vector<32x128xbf16>, vector<128x256xbf16>, vector<32x256xf32> -> vector<32x256xf32>
    %89 = arith.addf %82, %88 : vector<32x256xf32>
    %90 = vector.extract_strided_slice %39 {offsets = [1, 0, 0], sizes = [4, 8, 128], strides = [1, 1, 1]} : vector<6x8x128xf32> to vector<4x8x128xf32>
    %91 = vector.shape_cast %90 : vector<4x8x128xf32> to vector<32x128xf32>
    %92 = arith.truncf %91 : vector<32x128xf32> to vector<32x128xbf16>
    %c2_51 = arith.constant 2 : index
    %c0_52 = arith.constant 0 : index
    %c0_53 = arith.constant 0 : index
    %93 = vector.load %arg4[%c2_51, %c0_52, %c0_53] : memref<5x128x256xbf16, #tpu.memory_space<vmem>>, vector<1x128x256xbf16>
    %94 = vector.shape_cast %93 : vector<1x128x256xbf16> to vector<128x256xbf16>
    %cst_54 = arith.constant dense<0.000000e+00> : vector<32x256xf32>
    %95 = tpu.matmul %92, %94, %cst_54 {dimension_numbers = #tpu.dot_dimension_numbers<[1], [0], [0], [1], [0, 0, 1, 1], [], []>} : vector<32x128xbf16>, vector<128x256xbf16>, vector<32x256xf32> -> vector<32x256xf32>
    %96 = arith.addf %89, %95 : vector<32x256xf32>
    %97 = vector.extract_strided_slice %21 {offsets = [2, 0, 0], sizes = [4, 8, 128], strides = [1, 1, 1]} : vector<6x8x128xf32> to vector<4x8x128xf32>
    %98 = vector.shape_cast %97 : vector<4x8x128xf32> to vector<32x128xf32>
    %99 = arith.truncf %98 : vector<32x128xf32> to vector<32x128xbf16>
    %c3_55 = arith.constant 3 : index
    %c0_56 = arith.constant 0 : index
    %c0_57 = arith.constant 0 : index
    %100 = vector.load %arg4[%c3_55, %c0_56, %c0_57] : memref<5x128x256xbf16, #tpu.memory_space<vmem>>, vector<1x128x256xbf16>
    %101 = vector.shape_cast %100 : vector<1x128x256xbf16> to vector<128x256xbf16>
    %cst_58 = arith.constant dense<0.000000e+00> : vector<32x256xf32>
    %102 = tpu.matmul %99, %101, %cst_58 {dimension_numbers = #tpu.dot_dimension_numbers<[1], [0], [0], [1], [0, 0, 1, 1], [], []>} : vector<32x128xbf16>, vector<128x256xbf16>, vector<32x256xf32> -> vector<32x256xf32>
    %103 = arith.addf %96, %102 : vector<32x256xf32>
    %104 = vector.extract_strided_slice %39 {offsets = [2, 0, 0], sizes = [4, 8, 128], strides = [1, 1, 1]} : vector<6x8x128xf32> to vector<4x8x128xf32>
    %105 = vector.shape_cast %104 : vector<4x8x128xf32> to vector<32x128xf32>
    %106 = arith.truncf %105 : vector<32x128xf32> to vector<32x128xbf16>
    %c4_59 = arith.constant 4 : index
    %c0_60 = arith.constant 0 : index
    %c0_61 = arith.constant 0 : index
    %107 = vector.load %arg4[%c4_59, %c0_60, %c0_61] : memref<5x128x256xbf16, #tpu.memory_space<vmem>>, vector<1x128x256xbf16>
    %108 = vector.shape_cast %107 : vector<1x128x256xbf16> to vector<128x256xbf16>
    %cst_62 = arith.constant dense<0.000000e+00> : vector<32x256xf32>
    %109 = tpu.matmul %106, %108, %cst_62 {dimension_numbers = #tpu.dot_dimension_numbers<[1], [0], [0], [1], [0, 0, 1, 1], [], []>} : vector<32x128xbf16>, vector<128x256xbf16>, vector<32x256xf32> -> vector<32x256xf32>
    %110 = arith.addf %103, %109 : vector<32x256xf32>
    %111 = vector.extract_strided_slice %110 {offsets = [0, 0], sizes = [32, 128], strides = [1, 1]} : vector<32x256xf32> to vector<32x128xf32>
    %112 = vector.extract_strided_slice %110 {offsets = [0, 128], sizes = [32, 128], strides = [1, 1]} : vector<32x256xf32> to vector<32x128xf32>
    %113 = arith.maximumf %111, %112 : vector<32x128xf32>
    %114 = arith.maximumf %76, %113 : vector<32x128xf32>
    %115 = vector.broadcast %1 : vector<1x128xf32> to vector<32x128xf32>
    %116 = arith.addf %114, %115 : vector<32x128xf32>
    %cst_63 = arith.constant 0.000000e+00 : f32
    %117 = vector.broadcast %cst_63 : f32 to vector<32x128xf32>
    %118 = arith.maximumf %116, %117 : vector<32x128xf32>
    %119 = vector.shape_cast %118 : vector<32x128xf32> to vector<4x8x128xf32>
    %c0_64 = arith.constant 0 : index
    %c0_65 = arith.constant 0 : index
    %c0_66 = arith.constant 0 : index
    %120 = vector.load %arg13[%c0_64, %c0_65, %c0_66] : memref<4x8x128xf32, #tpu.memory_space<vmem>>, vector<4x8x128xf32>
    tpu.vector_store %arg13[%c0_64, %c0_65, %c0_66], %119 {strides = array<i32>} : memref<4x8x128xf32, #tpu.memory_space<vmem>>, vector<4x8x128xf32>,
    %c0_67 = arith.constant 0 : index
    %c0_68 = arith.constant 0 : index
    %c0_69 = arith.constant 0 : index
    %121 = vector.load %arg13[%c0_67, %c0_68, %c0_69] : memref<4x8x128xf32, #tpu.memory_space<vmem>>, vector<1x8x128xf32>
    %122 = vector.shape_cast %121 : vector<1x8x128xf32> to vector<8x128xf32>
    %123 = arith.truncf %122 : vector<8x128xf32> to vector<8x128xbf16>
    %c0_70 = arith.constant 0 : index
    %c0_71 = arith.constant 0 : index
    %c0_72 = arith.constant 0 : index
    %124 = vector.load %arg6[%c0_70, %c0_71, %c0_72] : memref<4x128x128xbf16, #tpu.memory_space<vmem>>, vector<1x128x128xbf16>
    %125 = vector.shape_cast %124 : vector<1x128x128xbf16> to vector<128x128xbf16>
    %cst_73 = arith.constant dense<0.000000e+00> : vector<8x128xf32>
    %126 = tpu.matmul %123, %125, %cst_73 {dimension_numbers = #tpu.dot_dimension_numbers<[1], [0], [0], [1], [0, 0, 1, 1], [], []>} : vector<8x128xbf16>, vector<128x128xbf16>, vector<8x128xf32> -> vector<8x128xf32>
    %c1_74 = arith.constant 1 : index
    %c0_75 = arith.constant 0 : index
    %c0_76 = arith.constant 0 : index
    %127 = vector.load %arg13[%c1_74, %c0_75, %c0_76] : memref<4x8x128xf32, #tpu.memory_space<vmem>>, vector<1x8x128xf32>
    %128 = vector.shape_cast %127 : vector<1x8x128xf32> to vector<8x128xf32>
    %129 = arith.truncf %128 : vector<8x128xf32> to vector<8x128xbf16>
    %c1_77 = arith.constant 1 : index
    %c0_78 = arith.constant 0 : index
    %c0_79 = arith.constant 0 : index
    %130 = vector.load %arg6[%c1_77, %c0_78, %c0_79] : memref<4x128x128xbf16, #tpu.memory_space<vmem>>, vector<1x128x128xbf16>
    %131 = vector.shape_cast %130 : vector<1x128x128xbf16> to vector<128x128xbf16>
    %cst_80 = arith.constant dense<0.000000e+00> : vector<8x128xf32>
    %132 = tpu.matmul %129, %131, %cst_80 {dimension_numbers = #tpu.dot_dimension_numbers<[1], [0], [0], [1], [0, 0, 1, 1], [], []>} : vector<8x128xbf16>, vector<128x128xbf16>, vector<8x128xf32> -> vector<8x128xf32>
    %133 = arith.addf %126, %132 : vector<8x128xf32>
    %c2_81 = arith.constant 2 : index
    %c0_82 = arith.constant 0 : index
    %c0_83 = arith.constant 0 : index
    %134 = vector.load %arg13[%c2_81, %c0_82, %c0_83] : memref<4x8x128xf32, #tpu.memory_space<vmem>>, vector<1x8x128xf32>
    %135 = vector.shape_cast %134 : vector<1x8x128xf32> to vector<8x128xf32>
    %136 = arith.truncf %135 : vector<8x128xf32> to vector<8x128xbf16>
    %c2_84 = arith.constant 2 : index
    %c0_85 = arith.constant 0 : index
    %c0_86 = arith.constant 0 : index
    %137 = vector.load %arg6[%c2_84, %c0_85, %c0_86] : memref<4x128x128xbf16, #tpu.memory_space<vmem>>, vector<1x128x128xbf16>
    %138 = vector.shape_cast %137 : vector<1x128x128xbf16> to vector<128x128xbf16>
    %cst_87 = arith.constant dense<0.000000e+00> : vector<8x128xf32>
    %139 = tpu.matmul %136, %138, %cst_87 {dimension_numbers = #tpu.dot_dimension_numbers<[1], [0], [0], [1], [0, 0, 1, 1], [], []>} : vector<8x128xbf16>, vector<128x128xbf16>, vector<8x128xf32> -> vector<8x128xf32>
    %140 = arith.addf %133, %139 : vector<8x128xf32>
    %c3_88 = arith.constant 3 : index
    %c0_89 = arith.constant 0 : index
    %c0_90 = arith.constant 0 : index
    %141 = vector.load %arg13[%c3_88, %c0_89, %c0_90] : memref<4x8x128xf32, #tpu.memory_space<vmem>>, vector<1x8x128xf32>
    %142 = vector.shape_cast %141 : vector<1x8x128xf32> to vector<8x128xf32>
    %143 = arith.truncf %142 : vector<8x128xf32> to vector<8x128xbf16>
    %c3_91 = arith.constant 3 : index
    %c0_92 = arith.constant 0 : index
    %c0_93 = arith.constant 0 : index
    %144 = vector.load %arg6[%c3_91, %c0_92, %c0_93] : memref<4x128x128xbf16, #tpu.memory_space<vmem>>, vector<1x128x128xbf16>
    %145 = vector.shape_cast %144 : vector<1x128x128xbf16> to vector<128x128xbf16>
    %cst_94 = arith.constant dense<0.000000e+00> : vector<8x128xf32>
    %146 = tpu.matmul %143, %145, %cst_94 {dimension_numbers = #tpu.dot_dimension_numbers<[1], [0], [0], [1], [0, 0, 1, 1], [], []>} : vector<8x128xbf16>, vector<128x128xbf16>, vector<8x128xf32> -> vector<8x128xf32>
    %147 = arith.addf %140, %146 : vector<8x128xf32>
    %c0_95 = arith.constant 0 : index
    %c0_96 = arith.constant 0 : index
    %148 = vector.load %arg7[%c0_95, %c0_96] : memref<1x128xf32, #tpu.memory_space<vmem>>, vector<1x128xf32>
    %149 = vector.broadcast %148 : vector<1x128xf32> to vector<8x128xf32>
    %150 = arith.addf %147, %149 : vector<8x128xf32>
    %cst_97 = arith.constant 0.000000e+00 : f32
    %151 = vector.broadcast %cst_97 : f32 to vector<8x128xf32>
    %152 = arith.maximumf %150, %151 : vector<8x128xf32>
    %153 = arith.truncf %152 : vector<8x128xf32> to vector<8x128xbf16>
    %c0_98 = arith.constant 0 : index
    %c0_99 = arith.constant 0 : index
    %154 = vector.load %arg8[%c0_98, %c0_99] : memref<128x128xbf16, #tpu.memory_space<vmem>>, vector<128x128xbf16>
    %cst_100 = arith.constant dense<0.000000e+00> : vector<8x128xf32>
    %155 = tpu.matmul %153, %154, %cst_100 {dimension_numbers = #tpu.dot_dimension_numbers<[1], [0], [0], [1], [0, 0, 1, 1], [], []>} : vector<8x128xbf16>, vector<128x128xbf16>, vector<8x128xf32> -> vector<8x128xf32>
    %c0_101 = arith.constant 0 : index
    %c0_102 = arith.constant 0 : index
    %156 = vector.load %arg9[%c0_101, %c0_102] : memref<1x128xf32, #tpu.memory_space<vmem>>, vector<1x128xf32>
    %157 = vector.broadcast %156 : vector<1x128xf32> to vector<8x128xf32>
    %158 = arith.addf %155, %157 : vector<8x128xf32>
    %cst_103 = arith.constant 0.000000e+00 : f32
    %159 = vector.broadcast %cst_103 : f32 to vector<8x128xf32>
    %160 = arith.maximumf %158, %159 : vector<8x128xf32>
    %161 = arith.truncf %160 : vector<8x128xf32> to vector<8x128xbf16>
    %c0_104 = arith.constant 0 : index
    %c0_105 = arith.constant 0 : index
    %162 = vector.load %arg10[%c0_104, %c0_105] : memref<128x128xbf16, #tpu.memory_space<vmem>>, vector<128x128xbf16>
    %cst_106 = arith.constant dense<0.000000e+00> : vector<8x128xf32>
    %163 = tpu.matmul %161, %162, %cst_106 {dimension_numbers = #tpu.dot_dimension_numbers<[1], [0], [0], [1], [0, 0, 1, 1], [], []>} : vector<8x128xbf16>, vector<128x128xbf16>, vector<8x128xf32> -> vector<8x128xf32>
    %c0_107 = arith.constant 0 : index
    %c0_108 = arith.constant 0 : index
    %164 = vector.load %arg11[%c0_107, %c0_108] : memref<1x128xf32, #tpu.memory_space<vmem>>, vector<1x128xf32>
    %165 = vector.broadcast %164 : vector<1x128xf32> to vector<8x128xf32>
    %166 = arith.addf %163, %165 : vector<8x128xf32>
    %c0_109 = arith.constant 0 : index
    %c0_110 = arith.constant 0 : index
    %167 = vector.load %arg12[%c0_109, %c0_110] : memref<8x128xf32, #tpu.memory_space<vmem>>, vector<8x128xf32>
    tpu.vector_store %arg12[%c0_109, %c0_110], %166 {strides = array<i32>} : memref<8x128xf32, #tpu.memory_space<vmem>>, vector<8x128xf32>,
    return
  }
  func.func @transform_0(%arg0: i32) -> (i32, i32, i32) {
    %c0_i32 = arith.constant 0 : i32
    %c0_i32_0 = arith.constant 0 : i32
    %c0_i32_1 = arith.constant 0 : i32
    return %c0_i32, %arg0, %c0_i32_0 : i32, i32, i32
  }
  func.func @transform_1(%arg0: i32) -> (i32, i32, i32, i32) {
    %c0_i32 = arith.constant 0 : i32
    %c0_i32_0 = arith.constant 0 : i32
    %c0_i32_1 = arith.constant 0 : i32
    %c0_i32_2 = arith.constant 0 : i32
    %c0_i32_3 = arith.constant 0 : i32
    return %c0_i32, %c0_i32_0, %c0_i32_1, %c0_i32_2 : i32, i32, i32, i32
  }
  func.func @transform_2(%arg0: i32) -> (i32, i32) {
    %c0_i32 = arith.constant 0 : i32
    %c0_i32_0 = arith.constant 0 : i32
    %c0_i32_1 = arith.constant 0 : i32
    return %c0_i32, %c0_i32_0 : i32, i32
  }
  func.func @transform_3(%arg0: i32) -> (i32, i32, i32) {
    %c0_i32 = arith.constant 0 : i32
    %c0_i32_0 = arith.constant 0 : i32
    %c0_i32_1 = arith.constant 0 : i32
    %c0_i32_2 = arith.constant 0 : i32
    return %c0_i32, %c0_i32_0, %c0_i32_1 : i32, i32, i32
  }
  func.func @transform_4(%arg0: i32) -> (i32, i32) {
    %c0_i32 = arith.constant 0 : i32
    %c0_i32_0 = arith.constant 0 : i32
    %c0_i32_1 = arith.constant 0 : i32
    return %c0_i32, %c0_i32_0 : i32, i32
  }
  func.func @transform_5(%arg0: i32) -> (i32, i32, i32) {
    %c0_i32 = arith.constant 0 : i32
    %c0_i32_0 = arith.constant 0 : i32
    %c0_i32_1 = arith.constant 0 : i32
    %c0_i32_2 = arith.constant 0 : i32
    return %c0_i32, %c0_i32_0, %c0_i32_1 : i32, i32, i32
  }
  func.func @transform_6(%arg0: i32) -> (i32, i32) {
    %c0_i32 = arith.constant 0 : i32
    %c0_i32_0 = arith.constant 0 : i32
    %c0_i32_1 = arith.constant 0 : i32
    return %c0_i32, %c0_i32_0 : i32, i32
  }
  func.func @transform_7(%arg0: i32) -> (i32, i32) {
    %c0_i32 = arith.constant 0 : i32
    %c0_i32_0 = arith.constant 0 : i32
    %c0_i32_1 = arith.constant 0 : i32
    return %c0_i32, %c0_i32_0 : i32, i32
  }
  func.func @transform_8(%arg0: i32) -> (i32, i32) {
    %c0_i32 = arith.constant 0 : i32
    %c0_i32_0 = arith.constant 0 : i32
    %c0_i32_1 = arith.constant 0 : i32
    return %c0_i32, %c0_i32_0 : i32, i32
  }
  func.func @transform_9(%arg0: i32) -> (i32, i32) {
    %c0_i32 = arith.constant 0 : i32
    %c0_i32_0 = arith.constant 0 : i32
    %c0_i32_1 = arith.constant 0 : i32
    return %c0_i32, %c0_i32_0 : i32, i32
  }
  func.func @transform_10(%arg0: i32) -> (i32, i32) {
    %c0_i32 = arith.constant 0 : i32
    %c0_i32_0 = arith.constant 0 : i32
    %c0_i32_1 = arith.constant 0 : i32
    return %c0_i32, %c0_i32_0 : i32, i32
  }
  func.func @transform_11(%arg0: i32) -> (i32, i32) {
    %c0_i32 = arith.constant 0 : i32
    %c0_i32_0 = arith.constant 0 : i32
    return %arg0, %c0_i32 : i32, i32
  }
}

</mosaic_0001>

<bundles_post_ra>
// kernel: lenet5_forward.1
= control target key start
LH: loop header
LB: loop body
LE: loop exit
PB: predicated region body
PF: predicated region fallthrough
CT: control target
= control target key end

     0   :  { %16 = vsyncpa [#allocation4], 0  ;;  %s4715_s0 = inlined_call_operand.vmem [shape: bf16[6,8,256], index: 0, kind: input, shape index: {}]   ;;  %s4716_s1 = inlined_call_operand.hbm [shape: bf16[2,2,256,256], index: 1, kind: input, shape index: {}]   ;;  %s4717_s2 = inlined_call_operand.vmem [shape: f32[1,128], index: 2, kind: input, shape index: {}]   ;;  %s4718_s3 = inlined_call_operand.hbm [shape: bf16[5,128,256], index: 3, kind: input, shape index: {}]   ;;  %s4719_s4 = inlined_call_operand.vmem [shape: f32[1,128], index: 4, kind: input, shape index: {}]   ;;  %s4720_s5 = inlined_call_operand.vmem [shape: bf16[4,128,128], index: 5, kind: input, shape index: {}]   ;;  %s4721_s6 = inlined_call_operand.vmem [shape: f32[1,128], index: 6, kind: input, shape index: {}]   ;;  %s4722_s7 = inlined_call_operand.vmem [shape: bf16[128,128], index: 7, kind: input, shape index: {}]   ;;  %s4723_s8 = inlined_call_operand.vmem [shape: f32[1,128], index: 8, kind: input, shape index: {}]   ;;  %s4724_s9 = inlined_call_operand.vmem [shape: bf16[128,128], index: 9, kind: input, shape index: {}]   ;;  %s4725_s10 = inlined_call_operand.vmem [shape: f32[1,128], index: 10, kind: input, shape index: {}]   ;;  %s4726_s11 = inlined_call_operand.vmem [shape: f32[8,128], index: 11, kind: output, shape index: {}]  }
   0x1   :  { %17 = vsyncpa [#allocation6], 0  ;;  %s3878_s17 = smov [#allocation3]  }
   0x2   :  { %s25_s18 = sshll.u32 %s3878_s17, 4  ;;  %s26_s18 = int_to_ptr.vmem [resolvable:$true] %s25_s18 }
   0x3   :  { %s3842_s19 = scalar_lea.vmem %s26_s18, 16384  ;;  %p3847_p1 = scmp.lt.s32.totalorder %s26_s18, %s26_s18 }
   0x4   :  { %p3843_p0 = scmp.ne.s32.totalorder %s26_s18, %s3842_s19  ;;  %p3848_p2 = scmp.lt.s32.totalorder %s3842_s19, %s3842_s19 }
   0x6   :  { %p3849_p3 = por %p3848_p2, %p3847_p1 }
   0x8   :  { %p3850_p4 = pnand %p3849_p3, %p3843_p0 }
   0xa   :  { %3853 = shalt.err (!%p3850_p4)
}
   0xb   :  { %s3879_s20 = smov 128   ;;  %s3880_s21 = smov 8  }
   0xc   :  { %31 = dma.hbm_to_vmem [thread:$0]  %s4716_s1, 16384, %s26_s18, [#allocation4], %s3879_s20, %s3879_s20, %s3880_s21  }
   0xd   :  { %s3881_s24 = smov [#allocation5]  }
   0xe   :  { %s39_s25 = sshll.u32 %s3881_s24, 4  ;;  %s40_s25 = int_to_ptr.vmem [resolvable:$true] %s39_s25 }
   0xf   :  { %s3862_s26 = scalar_lea.vmem %s40_s25, 10240  ;;  %p3867_p6 = scmp.lt.s32.totalorder %s40_s25, %s40_s25 }
  0x10   :  { %p3863_p5 = scmp.ne.s32.totalorder %s40_s25, %s3862_s26  ;;  %p3868_p7 = scmp.lt.s32.totalorder %s3862_s26, %s3862_s26 }
  0x12   :  { %p3869_p8 = por %p3868_p7, %p3867_p6 }
  0x14   :  { %p3870_p9 = pnand %p3869_p8, %p3863_p5 }
  0x16   :  { %3873 = shalt.err (!%p3870_p9)
}
  0x17   :  { %45 = dma.hbm_to_vmem [thread:$0]  %s4718_s3, 10240, %s40_s25, [#allocation6], %s3879_s20, %s3879_s20, %s3880_s21  }
  0x18   :  { %3874 = dma.done.wait [#allocation4], 16384  }
  0x19   :  { %3875 = vsyncadd [#allocation4], 4294950912 }
  0x1a   :  { %3876 = dma.done.wait [#allocation6], 10240  }
  0x1b   :  { %3877 = vsyncadd [#allocation6], 4294957056  ;;  %v3465_v0 = vld [vmem:[#allocation3 + $0x74] ss:$8 sps:$4 sm:$0xff]   ;;  %v3469_v2 = vld [vmem:[#allocation3 + $0x70] ss:$8 sps:$4 sm:$0xff]  }
  0x1c   :  { %v3467_v1 = vld [vmem:[#allocation3 + $0x174] ss:$8 sps:$4 sm:$0xff]   ;;  %297 = vmatprep.subr.bf16.mxu0 %v3465_v0  ;;  %v3470_v3 = vld [vmem:[#allocation3 + $0x170] ss:$8 sps:$4 sm:$0xff]   ;;  %v3471_v4 = vld [vmem:[#allocation3 + $0x64] ss:$8 sps:$4 sm:$0xff]  }
  0x1d   :  { %559 = vmatprep.subr.bf16.mxu1 %v3467_v1  ;;  %298 = vmatpush1.bf16.msra.mxu0 %v3469_v2  ;;  %v3473_v5 = vld [vmem:[#allocation3 + $0x164] ss:$8 sps:$4 sm:$0xff]   ;;  %v3475_v6 = vld [vmem:[#allocation3 + $0x60] ss:$8 sps:$4 sm:$0xff]   ;;  %v3477_v8 = vld [vmem:[#allocation3 + $0x54] ss:$8 sps:$4 sm:$0xff]  }
  0x1e   :  { %560 = vmatpush1.bf16.msra.mxu1 %v3470_v3  ;;  %299 = vmatprep.subr.bf16.mxu0 %v3471_v4  ;;  %v3476_v7 = vld [vmem:[#allocation3 + $0x160] ss:$8 sps:$4 sm:$0xff]   ;;  %v3479_v9 = vld [vmem:[#allocation3 + $0x154] ss:$8 sps:$4 sm:$0xff]   ;;  %v3481_v10 = vld [vmem:[#allocation3 + $0x50] ss:$8 sps:$4 sm:$0xff]  }
  0x1f   :  { %561 = vmatprep.subr.bf16.mxu1 %v3473_v5  ;;  %v3482_v11 = vld [vmem:[#allocation3 + $0x150] ss:$8 sps:$4 sm:$0xff]   ;;  %v3483_v12 = vld [vmem:[#allocation3 + $0x44] ss:$8 sps:$4 sm:$0xff]   ;;  %v3487_v14 = vld [vmem:[#allocation3 + $0x40] ss:$8 sps:$4 sm:$0xff]  }
  0x20   :  { %v3485_v13 = vld [vmem:[#allocation3 + $0x144] ss:$8 sps:$4 sm:$0xff]   ;;  %v3488_v15 = vld [vmem:[#allocation3 + $0x140] ss:$8 sps:$4 sm:$0xff]   ;;  %v3489_v16 = vld [vmem:[#allocation3 + $0x34] ss:$8 sps:$4 sm:$0xff]  }
  0x21   :  { %300 = vmatpush1.bf16.msra.mxu0 %v3475_v6  ;;  %v3491_v17 = vld [vmem:[#allocation3 + $0x134] ss:$8 sps:$4 sm:$0xff]   ;;  %v3493_v18 = vld [vmem:[#allocation3 + $0x30] ss:$8 sps:$4 sm:$0xff]   ;;  %v3495_v20 = vld [vmem:[#allocation3 + $0x24] ss:$8 sps:$4 sm:$0xff]  }
  0x22   :  { %562 = vmatpush1.bf16.msra.mxu1 %v3476_v7  ;;  %301 = vmatprep.subr.bf16.mxu0 %v3477_v8  ;;  %v3494_v19 = vld [vmem:[#allocation3 + $0x130] ss:$8 sps:$4 sm:$0xff]   ;;  %v3497_v21 = vld [vmem:[#allocation3 + $0x124] ss:$8 sps:$4 sm:$0xff]   ;;  %v3499_v22 = vld [vmem:[#allocation3 + $0x20] ss:$8 sps:$4 sm:$0xff]  }
  0x23   :  { %563 = vmatprep.subr.bf16.mxu1 %v3479_v9  ;;  %v3500_v23 = vld [vmem:[#allocation3 + $0x120] ss:$8 sps:$4 sm:$0xff]   ;;  %v3501_v24 = vld [vmem:[#allocation3 + $0x14] ss:$8 sps:$4 sm:$0xff]   ;;  %v3505_v26 = vld [vmem:[#allocation3 + $0x10] ss:$8 sps:$4 sm:$0xff]  }
  0x24   :  { %v3503_v25 = vld [vmem:[#allocation3 + $0x114] ss:$8 sps:$4 sm:$0xff]   ;;  %v3506_v27 = vld [vmem:[#allocation3 + $0x110] ss:$8 sps:$4 sm:$0xff]   ;;  %v3507_v28 = vld [vmem:[#allocation3 + $0x4] ss:$8 sps:$4 sm:$0xff]  }
  0x25   :  { %302 = vmatpush1.bf16.msra.mxu0 %v3481_v10  ;;  %v3509_v29 = vld [vmem:[#allocation3 + $0x104] ss:$8 sps:$4 sm:$0xff]   ;;  %v3511_v30 = vld [vmem:[#allocation3] ss:$8 sps:$4 sm:$0xff]   ;;  %v3513_v32 = vld [vmem:[#allocation3 + $0xf4] ss:$8 sps:$4 sm:$0xff]  }
  0x26   :  { %564 = vmatpush1.bf16.msra.mxu1 %v3482_v11  ;;  %303 = vmatprep.subr.bf16.mxu0 %v3483_v12  ;;  %v3512_v31 = vld [vmem:[#allocation3 + $0x100] ss:$8 sps:$4 sm:$0xff]   ;;  %v3515_v33 = vld [vmem:[#allocation3 + $0x1f4] ss:$8 sps:$4 sm:$0xff]   ;;  %v3517_v34 = vld [vmem:[#allocation3 + $0xf0] ss:$8 sps:$4 sm:$0xff]  }
  0x27   :  { %565 = vmatprep.subr.bf16.mxu1 %v3485_v13  ;;  %v3518_v35 = vld [vmem:[#allocation3 + $0x1f0] ss:$8 sps:$4 sm:$0xff]   ;;  %v3519_v36 = vld [vmem:[#allocation3 + $0xe4] ss:$8 sps:$4 sm:$0xff]   ;;  %v3523_v38 = vld [vmem:[#allocation3 + $0xe0] ss:$8 sps:$4 sm:$0xff]  }
  0x28   :  { %v3521_v37 = vld [vmem:[#allocation3 + $0x1e4] ss:$8 sps:$4 sm:$0xff]   ;;  %v3524_v39 = vld [vmem:[#allocation3 + $0x1e0] ss:$8 sps:$4 sm:$0xff]   ;;  %v3525_v40 = vld [vmem:[#allocation3 + $0xd4] ss:$8 sps:$4 sm:$0xff]  }
  0x29   :  { %304 = vmatpush1.bf16.msra.mxu0 %v3487_v14  ;;  %v3527_v41 = vld [vmem:[#allocation3 + $0x1d4] ss:$8 sps:$4 sm:$0xff]   ;;  %v3529_v42 = vld [vmem:[#allocation3 + $0xd0] ss:$8 sps:$4 sm:$0xff]   ;;  %v3531_v44 = vld [vmem:[#allocation3 + $0xc4] ss:$8 sps:$4 sm:$0xff]  }
  0x2a   :  { %566 = vmatpush1.bf16.msra.mxu1 %v3488_v15  ;;  %305 = vmatprep.subr.bf16.mxu0 %v3489_v16  ;;  %v3530_v43 = vld [vmem:[#allocation3 + $0x1d0] ss:$8 sps:$4 sm:$0xff]   ;;  %v3533_v45 = vld [vmem:[#allocation3 + $0x1c4] ss:$8 sps:$4 sm:$0xff]   ;;  %v3535_v46 = vld [vmem:[#allocation3 + $0xc0] ss:$8 sps:$4 sm:$0xff]  }
  0x2b   :  { %567 = vmatprep.subr.bf16.mxu1 %v3491_v17  ;;  %v3536_v47 = vld [vmem:[#allocation3 + $0x1c0] ss:$8 sps:$4 sm:$0xff]   ;;  %v3954_v48 = vld [vmem:[%s4715_s0 + $0x4] ss:$8 sps:$4 sm:$0xff]   ;;  %v3537_v49 = vld [vmem:[#allocation3 + $0xb4] ss:$8 sps:$4 sm:$0xff]  }
  0x2c   :  { %v3539_v50 = vld [vmem:[#allocation3 + $0x1b4] ss:$8 sps:$4 sm:$0xff]   ;;  %329 = vmatprep.mubr.bf16.mxu0 %v3954_v48  ;;  %591 = vmatprep.mubr.bf16.mxu1 %v3954_v48  ;;  %v3541_v51 = vld [vmem:[#allocation3 + $0xb0] ss:$8 sps:$4 sm:$0xff]   ;;  %v3543_v53 = vld [vmem:[#allocation3 + $0xa4] ss:$8 sps:$4 sm:$0xff]  }
  0x2d   :  { %306 = vmatpush1.bf16.msra.mxu0 %v3493_v18  ;;  %v3542_v52 = vld [vmem:[#allocation3 + $0x1b0] ss:$8 sps:$4 sm:$0xff]   ;;  %v3545_v54 = vld [vmem:[#allocation3 + $0x1a4] ss:$8 sps:$4 sm:$0xff]   ;;  %v3547_v55 = vld [vmem:[#allocation3 + $0xa0] ss:$8 sps:$4 sm:$0xff]  }
  0x2e   :  { %568 = vmatpush1.bf16.msra.mxu1 %v3494_v19  ;;  %307 = vmatprep.subr.bf16.mxu0 %v3495_v20  ;;  %v3548_v56 = vld [vmem:[#allocation3 + $0x1a0] ss:$8 sps:$4 sm:$0xff]   ;;  %v3549_v57 = vld [vmem:[#allocation3 + $0x94] ss:$8 sps:$4 sm:$0xff]   ;;  %v3553_v59 = vld [vmem:[#allocation3 + $0x90] ss:$8 sps:$4 sm:$0xff]  }
  0x2f   :  { %569 = vmatprep.subr.bf16.mxu1 %v3497_v21  ;;  %v3551_v58 = vld [vmem:[#allocation3 + $0x194] ss:$8 sps:$4 sm:$0xff]   ;;  %v3554_v60 = vld [vmem:[#allocation3 + $0x190] ss:$8 sps:$4 sm:$0xff]   ;;  %v3555_v61 = vld [vmem:[#allocation3 + $0x84] ss:$8 sps:$4 sm:$0xff]  }
  0x30   :  { %v3557_v62 = vld [vmem:[#allocation3 + $0x184] ss:$8 sps:$4 sm:$0xff]   ;;  %v3559_v63 = vld [vmem:[#allocation3 + $0x80] ss:$8 sps:$4 sm:$0xff]   ;;  %v3566_v1 = vld [vmem:[#allocation3 + $0x274] ss:$8 sps:$4 sm:$0xff]  }
  0x31   :  { %308 = vmatpush1.bf16.msra.mxu0 %v3499_v22  ;;  %v3560_v0 = vld [vmem:[#allocation3 + $0x180] ss:$8 sps:$4 sm:$0xff]   ;;  %v3569_v2 = vld [vmem:[#allocation3 + $0x374] ss:$8 sps:$4 sm:$0xff]   ;;  %v3564_v4 = vld [vmem:[#allocation3 + $0x270] ss:$8 sps:$4 sm:$0xff]  }
  0x32   :  { %570 = vmatpush1.bf16.msra.mxu1 %v3500_v23  ;;  %309 = vmatprep.subr.bf16.mxu0 %v3501_v24  ;;  %v3961_v3 = vld [vmem:[%s4715_s0] ss:$8 sps:$4 sm:$0xff]   ;;  %v3567_v5 = vld [vmem:[#allocation3 + $0x370] ss:$8 sps:$4 sm:$0xff]   ;;  %v3572_v6 = vld [vmem:[#allocation3 + $0x264] ss:$8 sps:$4 sm:$0xff]  }
  0x33   :  { %571 = vmatprep.subr.bf16.mxu1 %v3503_v25  ;;  %v3575_v7 = vld [vmem:[#allocation3 + $0x364] ss:$8 sps:$4 sm:$0xff]   ;;  %v3966_v8 = vld [vmem:[%s4715_s0 + $0x14] ss:$8 sps:$4 sm:$0xff]   ;;  %v3570_v9 = vld [vmem:[#allocation3 + $0x260] ss:$8 sps:$4 sm:$0xff]  }
  0x34   :  { %v3573_v10 = vld [vmem:[#allocation3 + $0x360] ss:$8 sps:$4 sm:$0xff]   ;;  %v3581_v11 = vld [vmem:[#allocation3 + $0x254] ss:$8 sps:$4 sm:$0xff]   ;;  %v3975_v13 = vld [vmem:[%s4715_s0 + $0x10] ss:$8 sps:$4 sm:$0xff]  }
  0x35   :  { %310 = vmatpush1.bf16.msra.mxu0 %v3505_v26  ;;  %v3584_v12 = vld [vmem:[#allocation3 + $0x354] ss:$8 sps:$4 sm:$0xff]   ;;  %v3579_v14 = vld [vmem:[#allocation3 + $0x250] ss:$8 sps:$4 sm:$0xff]   ;;  %v3587_v16 = vld [vmem:[#allocation3 + $0x244] ss:$8 sps:$4 sm:$0xff]  }
  0x36   :  { %572 = vmatpush1.bf16.msra.mxu1 %v3506_v27  ;;  %311 = vmatprep.subr.bf16.mxu0 %v3507_v28  ;;  %v3582_v15 = vld [vmem:[#allocation3 + $0x350] ss:$8 sps:$4 sm:$0xff]   ;;  %v3590_v17 = vld [vmem:[#allocation3 + $0x344] ss:$8 sps:$4 sm:$0xff]   ;;  %v3585_v18 = vld [vmem:[#allocation3 + $0x240] ss:$8 sps:$4 sm:$0xff]  }
  0x37   :  { %573 = vmatprep.subr.bf16.mxu1 %v3509_v29  ;;  %v3588_v19 = vld [vmem:[#allocation3 + $0x340] ss:$8 sps:$4 sm:$0xff]   ;;  %v3593_v20 = vld [vmem:[#allocation3 + $0x234] ss:$8 sps:$4 sm:$0xff]   ;;  %v3591_v22 = vld [vmem:[#allocation3 + $0x230] ss:$8 sps:$4 sm:$0xff]  }
  0x38   :  { %v3596_v21 = vld [vmem:[#allocation3 + $0x334] ss:$8 sps:$4 sm:$0xff]   ;;  %v3982_v23 = vld [vmem:[%s4715_s0 + $0x24] ss:$8 sps:$4 sm:$0xff]   ;;  %v3594_v24 = vld [vmem:[#allocation3 + $0x330] ss:$8 sps:$4 sm:$0xff]  }
  0x39   :  { %312 = vmatpush1.bf16.msra.mxu0 %v3511_v30  ;;  %v3987_v25 = vld [vmem:[%s4715_s0 + $0x20] ss:$8 sps:$4 sm:$0xff]   ;;  %v3599_v26 = vld [vmem:[#allocation3 + $0x224] ss:$8 sps:$4 sm:$0xff]   ;;  %v3605_v30 = vld [vmem:[#allocation3 + $0x214] ss:$8 sps:$4 sm:$0xff]  }
  0x3a   :  { %574 = vmatpush1.bf16.msra.mxu1 %v3512_v31  ;;  %313 = vmatprep.subr.bf16.mxu0 %v3513_v32  ;;  %v3602_v27 = vld [vmem:[#allocation3 + $0x324] ss:$8 sps:$4 sm:$0xff]   ;;  %v3597_v28 = vld [vmem:[#allocation3 + $0x220] ss:$8 sps:$4 sm:$0xff]   ;;  %v3608_v31 = vld [vmem:[#allocation3 + $0x314] ss:$8 sps:$4 sm:$0xff]  }
  0x3b   :  { %575 = vmatprep.subr.bf16.mxu1 %v3515_v33  ;;  %v3600_v29 = vld [vmem:[#allocation3 + $0x320] ss:$8 sps:$4 sm:$0xff]   ;;  %v3603_v32 = vld [vmem:[#allocation3 + $0x210] ss:$8 sps:$4 sm:$0xff]   ;;  %vm3884_vm0 = vmmov 0  }
  0x3c   :  { %v3606_v33 = vld [vmem:[#allocation3 + $0x310] ss:$8 sps:$4 sm:$0xff]  }
  0x3d   :  { %314 = vmatpush2.bf16.msra.mxu0 %v3517_v34  ;;  %v3611_v34 = vld [vmem:[#allocation3 + $0x204] ss:$8 sps:$4 sm:$0xff]  }
  0x3e   :  { %576 = vmatpush2.bf16.msra.mxu1 %v3518_v35  ;;  %315 = vmatprep.subr.bf16.mxu0 %v3519_v36  ;;  %v3614_v35 = vld [vmem:[#allocation3 + $0x304] ss:$8 sps:$4 sm:$0xff]   ;;  %v3609_v36 = vld [vmem:[#allocation3 + $0x200] ss:$8 sps:$4 sm:$0xff]  }
  0x3f   :  { %577 = vmatprep.subr.bf16.mxu1 %v3521_v37  ;;  %v3612_v37 = vld [vmem:[#allocation3 + $0x300] ss:$8 sps:$4 sm:$0xff]  }
  0x41   :  { %316 = vmatpush2.bf16.msra.mxu0 %v3523_v38  ;;  %v3617_v38 = vld [vmem:[#allocation3 + $0x2f4] ss:$8 sps:$4 sm:$0xff]  }
  0x42   :  { %578 = vmatpush2.bf16.msra.mxu1 %v3524_v39  ;;  %317 = vmatprep.subr.bf16.mxu0 %v3525_v40  ;;  %v3620_v39 = vld [vmem:[#allocation3 + $0x3f4] ss:$8 sps:$4 sm:$0xff]   ;;  %v3615_v40 = vld [vmem:[#allocation3 + $0x2f0] ss:$8 sps:$4 sm:$0xff]  }
  0x43   :  { %579 = vmatprep.subr.bf16.mxu1 %v3527_v41  ;;  %v3618_v41 = vld [vmem:[#allocation3 + $0x3f0] ss:$8 sps:$4 sm:$0xff]  }
  0x45   :  { %318 = vmatpush2.bf16.msra.mxu0 %v3529_v42  ;;  %v3623_v42 = vld [vmem:[#allocation3 + $0x2e4] ss:$8 sps:$4 sm:$0xff]  }
  0x46   :  { %580 = vmatpush2.bf16.msra.mxu1 %v3530_v43  ;;  %319 = vmatprep.subr.bf16.mxu0 %v3531_v44  ;;  %v3626_v43 = vld [vmem:[#allocation3 + $0x3e4] ss:$8 sps:$4 sm:$0xff]   ;;  %v3621_v44 = vld [vmem:[#allocation3 + $0x2e0] ss:$8 sps:$4 sm:$0xff]  }
  0x47   :  { %581 = vmatprep.subr.bf16.mxu1 %v3533_v45  ;;  %v3624_v45 = vld [vmem:[#allocation3 + $0x3e0] ss:$8 sps:$4 sm:$0xff]  }
  0x49   :  { %320 = vmatpush2.bf16.msra.mxu0 %v3535_v46  ;;  %v3629_v46 = vld [vmem:[#allocation3 + $0x2d4] ss:$8 sps:$4 sm:$0xff]  }
  0x4a   :  { %582 = vmatpush2.bf16.msra.mxu1 %v3536_v47  ;;  %321 = vmatprep.subr.bf16.mxu0 %v3537_v49  ;;  %v3632_v47 = vld [vmem:[#allocation3 + $0x3d4] ss:$8 sps:$4 sm:$0xff]   ;;  %v3630_v49 = vld [vmem:[#allocation3 + $0x3d0] ss:$8 sps:$4 sm:$0xff]  }
  0x4b   :  { %583 = vmatprep.subr.bf16.mxu1 %v3539_v50  ;;  %v3635_v50 = vld [vmem:[#allocation3 + $0x2c4] ss:$8 sps:$4 sm:$0xff]  }
  0x4d   :  { %322 = vmatpush2.bf16.msra.mxu0 %v3541_v51  ;;  %v3638_v51 = vld [vmem:[#allocation3 + $0x3c4] ss:$8 sps:$4 sm:$0xff]  }
  0x4e   :  { %584 = vmatpush2.bf16.msra.mxu1 %v3542_v52  ;;  %323 = vmatprep.subr.bf16.mxu0 %v3543_v53  ;;  %v3633_v52 = vld [vmem:[#allocation3 + $0x2c0] ss:$8 sps:$4 sm:$0xff]  }
  0x4f   :  { %585 = vmatprep.subr.bf16.mxu1 %v3545_v54  ;;  %v3636_v53 = vld [vmem:[#allocation3 + $0x3c0] ss:$8 sps:$4 sm:$0xff]   ;;  %v3644_v54 = vld [vmem:[#allocation3 + $0x2b4] ss:$8 sps:$4 sm:$0xff]  }
  0x51   :  { %324 = vmatpush2.bf16.msra.mxu0 %v3547_v55  ;;  %v3647_v55 = vld [vmem:[#allocation3 + $0x3b4] ss:$8 sps:$4 sm:$0xff]  }
  0x52   :  { %586 = vmatpush2.bf16.msra.mxu1 %v3548_v56  ;;  %325 = vmatprep.subr.bf16.mxu0 %v3549_v57  ;;  %v3642_v56 = vld [vmem:[#allocation3 + $0x2b0] ss:$8 sps:$4 sm:$0xff]  }
  0x53   :  { %587 = vmatprep.subr.bf16.mxu1 %v3551_v58  ;;  %v3645_v57 = vld [vmem:[#allocation3 + $0x3b0] ss:$8 sps:$4 sm:$0xff]   ;;  %v3650_v58 = vld [vmem:[#allocation3 + $0x2a4] ss:$8 sps:$4 sm:$0xff]  }
  0x55   :  { %326 = vmatpush2.bf16.msra.mxu0 %v3553_v59  ;;  %v3653_v59 = vld [vmem:[#allocation3 + $0x3a4] ss:$8 sps:$4 sm:$0xff]  }
  0x56   :  { %588 = vmatpush2.bf16.msra.mxu1 %v3554_v60  ;;  %327 = vmatprep.subr.bf16.mxu0 %v3555_v61  ;;  %v3648_v60 = vld [vmem:[#allocation3 + $0x2a0] ss:$8 sps:$4 sm:$0xff]  }
  0x57   :  { %589 = vmatprep.subr.bf16.mxu1 %v3557_v62  ;;  %v3651_v61 = vld [vmem:[#allocation3 + $0x3a0] ss:$8 sps:$4 sm:$0xff]   ;;  %v3656_v62 = vld [vmem:[#allocation3 + $0x294] ss:$8 sps:$4 sm:$0xff]  }
  0x59   :  { %328 = vmatpush2.bf16.msra.mxu0 %v3559_v63  ;;  %v3659_v63 = vld [vmem:[#allocation3 + $0x394] ss:$8 sps:$4 sm:$0xff]  }
  0x5a   :  { %590 = vmatpush2.bf16.msra.mxu1 %v3560_v0  ;;  %845 = vmatprep.subr.bf16.mxu0 %v3566_v1  ;;  %v3654_v0 = vld [vmem:[#allocation3 + $0x290] ss:$8 sps:$4 sm:$0xff]  }
  0x5b   :  { %1107 = vmatprep.subr.bf16.mxu1 %v3569_v2  ;;  %v3657_v1 = vld [vmem:[#allocation3 + $0x390] ss:$8 sps:$4 sm:$0xff]   ;;  %v3662_v2 = vld [vmem:[#allocation3 + $0x284] ss:$8 sps:$4 sm:$0xff]  }
  0x5c   :  { %330 = vmatmul.mubr.bf16.vlgmr.msra.gmra.mxu0 %v3961_v3 }
  0x5d   :  { %592 = vmatmul.mubr.bf16.vlgmr.msra.gmra.mxu1 %v3961_v3  ;;  %846 = vmatpush1.bf16.msra.mxu0 %v3564_v4  ;;  %v3665_v4 = vld [vmem:[#allocation3 + $0x384] ss:$8 sps:$4 sm:$0xff]  }
  0x5e   :  { %1108 = vmatpush1.bf16.msra.mxu1 %v3567_v5  ;;  %847 = vmatprep.subr.bf16.mxu0 %v3572_v6  ;;  %v3660_v5 = vld [vmem:[#allocation3 + $0x280] ss:$8 sps:$4 sm:$0xff]  }
  0x5f   :  { %1109 = vmatprep.subr.bf16.mxu1 %v3575_v7  ;;  %339 = vmatprep.mubr.bf16.mxu0 %v3966_v8  ;;  %v3663_v6 = vld [vmem:[#allocation3 + $0x380] ss:$8 sps:$4 sm:$0xff]   ;;  %v3995_v7 = vld [vmem:[#allocation5 + $0x74] ss:$8 sps:$4 sm:$0xff]  }
  0x60   :  { %601 = vmatprep.mubr.bf16.mxu1 %v3966_v8 }
  0x61   :  { %848 = vmatpush1.bf16.msra.mxu0 %v3570_v9  ;;  %v3997_v9 = vld [vmem:[#allocation5 + $0x70] ss:$8 sps:$4 sm:$0xff]  }
  0x62   :  { %1110 = vmatpush1.bf16.msra.mxu1 %v3573_v10  ;;  %849 = vmatprep.subr.bf16.mxu0 %v3581_v11  ;;  %v4000_v10 = vld [vmem:[#allocation5 + $0x64] ss:$8 sps:$4 sm:$0xff]   ;;  %v4004_v11 = vld [vmem:[#allocation5 + $0x60] ss:$8 sps:$4 sm:$0xff]  }
  0x63   :  { %1111 = vmatprep.subr.bf16.mxu1 %v3584_v12  ;;  %v4010_v12 = vld [vmem:[#allocation5 + $0x54] ss:$8 sps:$4 sm:$0xff]  }
  0x64   :  { %340 = vmatmul.mubr.bf16.gmra.mxu0 %v3975_v13 }
  0x65   :  { %602 = vmatmul.mubr.bf16.gmra.mxu1 %v3975_v13  ;;  %850 = vmatpush1.bf16.msra.mxu0 %v3579_v14  ;;  %v4012_v14 = vld [vmem:[#allocation5 + $0x50] ss:$8 sps:$4 sm:$0xff]  }
  0x66   :  { %1112 = vmatpush1.bf16.msra.mxu1 %v3582_v15  ;;  %851 = vmatprep.subr.bf16.mxu0 %v3587_v16  ;;  %v4016_v15 = vld [vmem:[#allocation5 + $0x44] ss:$8 sps:$4 sm:$0xff]   ;;  %v4028_v16 = vld [vmem:[#allocation5 + $0x30] ss:$8 sps:$4 sm:$0xff]  }
  0x67   :  { %1113 = vmatprep.subr.bf16.mxu1 %v3590_v17  ;;  %349 = vmatprep.mubr.bf16.mxu0 %v3982_v23  ;;  %v4030_v17 = vld [vmem:[#allocation5 + $0x24] ss:$8 sps:$4 sm:$0xff]  }
  0x68   :  { %611 = vmatprep.mubr.bf16.mxu1 %v3982_v23 }
  0x69   :  { %852 = vmatpush1.bf16.msra.mxu0 %v3585_v18  ;;  %v4038_v18 = vld [vmem:[#allocation5 + $0x14] ss:$8 sps:$4 sm:$0xff]  }
  0x6a   :  { %1114 = vmatpush1.bf16.msra.mxu1 %v3588_v19  ;;  %853 = vmatprep.subr.bf16.mxu0 %v3593_v20  ;;  %v4728_v19 = vmov 0   ;;  %v4044_v20 = vld [vmem:[#allocation5 + $0x10] ss:$8 sps:$4 sm:$0xff]  }
  0x6b   :  { %1115 = vmatprep.subr.bf16.mxu1 %v3596_v21  ;;  %v4048_v21 = vld [vmem:[#allocation5 + $0x4] ss:$8 sps:$4 sm:$0xff]  }
  0x6c   :  { %350 = vmatmul.mubr.bf16.gmra.mxu0 %v3987_v25 }
  0x6d   :  { %612 = vmatmul.mubr.bf16.gmra.mxu1 %v3987_v25  ;;  %854 = vmatpush1.bf16.msra.mxu0 %v3591_v22  ;;  %v4050_v22 = vld [vmem:[#allocation5 + $0xf0] ss:$8 sps:$4 sm:$0xff]  }
  0x6e   :  { %1116 = vmatpush1.bf16.msra.mxu1 %v3594_v24  ;;  %855 = vmatprep.subr.bf16.mxu0 %v3599_v26  ;;  %v4055_v24 = vld [vmem:[#allocation5] ss:$8 sps:$4 sm:$0xff]   ;;  %v4061_v26 = vld [vmem:[#allocation5 + $0x1f4] ss:$8 sps:$4 sm:$0xff]  }
  0x6f   :  { %1117 = vmatprep.subr.bf16.mxu1 %v3602_v27  ;;  %877 = vmatprep.mubr.bf16.mxu0 %v3954_v48  ;;  %4746 = vst [vmem:[#allocation9_spill] sm:$0xff] %v4061_v26  ;;  %v4064_v27 = vld [vmem:[#allocation5 + $0xe0] ss:$8 sps:$4 sm:$0xff]  }
  0x70   :  { %1139 = vmatprep.mubr.bf16.mxu1 %v3954_v48  ;;  %v3627_v48 = vld [vmem:[#allocation3 + $0x2d0] ss:$8 sps:$4 sm:$0xff]  }
  0x71   :  { %856 = vmatpush1.bf16.msra.mxu0 %v3597_v28  ;;  %v4067_v28 = vld [vmem:[#allocation5 + $0xd4] ss:$8 sps:$4 sm:$0xff]  }
  0x72   :  { %1118 = vmatpush1.bf16.msra.mxu1 %v3600_v29  ;;  %857 = vmatprep.subr.bf16.mxu0 %v3605_v30  ;;  %v4072_v29 = vld [vmem:[#allocation5 + $0xd0] ss:$8 sps:$4 sm:$0xff]   ;;  %v4075_v30 = vld [vmem:[#allocation5 + $0xc4] ss:$8 sps:$4 sm:$0xff]  }
  0x73   :  { %1119 = vmatprep.subr.bf16.mxu1 %v3608_v31  ;;  %v4078_v31 = vld [vmem:[#allocation5 + $0xc0] ss:$8 sps:$4 sm:$0xff]  }
  0x75   :  { %858 = vmatpush1.bf16.msra.mxu0 %v3603_v32  ;;  %v4082_v32 = vld [vmem:[#allocation5 + $0xb4] ss:$8 sps:$4 sm:$0xff]  }
  0x76   :  { %1120 = vmatpush1.bf16.msra.mxu1 %v3606_v33  ;;  %859 = vmatprep.subr.bf16.mxu0 %v3611_v34  ;;  %v4084_v33 = vld [vmem:[#allocation5 + $0xb0] ss:$8 sps:$4 sm:$0xff]   ;;  %v4088_v34 = vld [vmem:[#allocation5 + $0xa4] ss:$8 sps:$4 sm:$0xff]  }
  0x77   :  { %1121 = vmatprep.subr.bf16.mxu1 %v3614_v35  ;;  %v4090_v35 = vld [vmem:[#allocation5 + $0xa0] ss:$8 sps:$4 sm:$0xff]  }
  0x79   :  { %860 = vmatpush1.bf16.msra.mxu0 %v3609_v36  ;;  %v4094_v36 = vld [vmem:[#allocation5 + $0x94] ss:$8 sps:$4 sm:$0xff]  }
  0x7a   :  { %1122 = vmatpush1.bf16.msra.mxu1 %v3612_v37  ;;  %861 = vmatprep.subr.bf16.mxu0 %v3617_v38  ;;  %v4096_v37 = vld [vmem:[#allocation5 + $0x90] ss:$8 sps:$4 sm:$0xff]   ;;  %v4100_v38 = vld [vmem:[#allocation5 + $0x84] ss:$8 sps:$4 sm:$0xff]  }
  0x7b   :  { %1123 = vmatprep.subr.bf16.mxu1 %v3620_v39  ;;  %v4102_v39 = vld [vmem:[#allocation5 + $0x80] ss:$8 sps:$4 sm:$0xff]  }
  0x7d   :  { %862 = vmatpush2.bf16.msra.mxu0 %v3615_v40  ;;  %v4106_v40 = vld [vmem:[#allocation5 + $0x174] ss:$8 sps:$4 sm:$0xff]  }
  0x7e   :  { %1124 = vmatpush2.bf16.msra.mxu1 %v3618_v41  ;;  %863 = vmatprep.subr.bf16.mxu0 %v3623_v42 }
  0x7f   :  { %1125 = vmatprep.subr.bf16.mxu1 %v3626_v43 }
  0x81   :  { %864 = vmatpush2.bf16.msra.mxu0 %v3621_v44 }
  0x82   :  { %1126 = vmatpush2.bf16.msra.mxu1 %v3624_v45  ;;  %865 = vmatprep.subr.bf16.mxu0 %v3629_v46 }
  0x83   :  { %1127 = vmatprep.subr.bf16.mxu1 %v3632_v47 }
  0x85   :  { %866 = vmatpush2.bf16.msra.mxu0 %v3627_v48 }
  0x86   :  { %1128 = vmatpush2.bf16.msra.mxu1 %v3630_v49  ;;  %867 = vmatprep.subr.bf16.mxu0 %v3635_v50  ;;  %v4112_v50 = vld [vmem:[%s4717_s2] ss:$0 sm:$0xff] }
  0x87   :  { %1129 = vmatprep.subr.bf16.mxu1 %v3638_v51 }
  0x89   :  { %868 = vmatpush2.bf16.msra.mxu0 %v3633_v52 }
  0x8a   :  { %1130 = vmatpush2.bf16.msra.mxu1 %v3636_v53  ;;  %869 = vmatprep.subr.bf16.mxu0 %v3644_v54 }
  0x8b   :  { %1131 = vmatprep.subr.bf16.mxu1 %v3647_v55 }
  0x8d   :  { %870 = vmatpush2.bf16.msra.mxu0 %v3642_v56 }
  0x8e   :  { %1132 = vmatpush2.bf16.msra.mxu1 %v3645_v57  ;;  %871 = vmatprep.subr.bf16.mxu0 %v3650_v58 }
  0x8f   :  { %1133 = vmatprep.subr.bf16.mxu1 %v3653_v59 }
  0x91   :  { %872 = vmatpush2.bf16.msra.mxu0 %v3648_v60 }
  0x92   :  { %1134 = vmatpush2.bf16.msra.mxu1 %v3651_v61  ;;  %873 = vmatprep.subr.bf16.mxu0 %v3656_v62 }
  0x93   :  { %1135 = vmatprep.subr.bf16.mxu1 %v3659_v63 }
  0x95   :  { %874 = vmatpush2.bf16.msra.mxu0 %v3654_v0 }
  0x96   :  { %1136 = vmatpush2.bf16.msra.mxu1 %v3657_v1  ;;  %875 = vmatprep.subr.bf16.mxu0 %v3662_v2 }
  0x97   :  { %1137 = vmatprep.subr.bf16.mxu1 %v3665_v4 }
  0x99   :  { %876 = vmatpush2.bf16.msra.mxu0 %v3660_v5 }
  0x9a   :  { %1138 = vmatpush2.bf16.msra.mxu1 %v3663_v6 }
  0x9b   :  { %1444 = vmatprep.subr.bf16.mxu1 %v3995_v7 }
  0x9c   :  { %878 = vmatmul.mubr.bf16.vlgmr.msra.gmra.mxu0 %v3961_v3 }
  0x9d   :  { %1140 = vmatmul.mubr.bf16.vlgmr.msra.gmra.mxu1 %v3961_v3  ;;  %887 = vmatprep.mubr.bf16.mxu0 %v3966_v8  ;;  %v4020_v3 = vld [vmem:[#allocation5 + $0x40] ss:$8 sps:$4 sm:$0xff]  }
  0x9e   :  { %1149 = vmatprep.mubr.bf16.mxu1 %v3966_v8  ;;  %1445 = vmatpush1.bf16.msra.mxu1 %v3997_v9  ;;  %v4026_v8 = vld [vmem:[#allocation5 + $0x34] ss:$8 sps:$4 sm:$0xff]  }
  0x9f   :  { %1446 = vmatprep.subr.bf16.mxu1 %v4000_v10 }
  0xa2   :  { %1447 = vmatpush1.bf16.msra.mxu1 %v4004_v11 }
  0xa3   :  { %1448 = vmatprep.subr.bf16.mxu1 %v4010_v12 }
  0xa4   :  { %888 = vmatmul.mubr.bf16.gmra.mxu0 %v3975_v13 }
  0xa5   :  { %1150 = vmatmul.mubr.bf16.gmra.mxu1 %v3975_v13  ;;  %897 = vmatprep.mubr.bf16.mxu0 %v3982_v23  ;;  %v4036_v13 = vld [vmem:[#allocation5 + $0x20] ss:$8 sps:$4 sm:$0xff]  }
  0xa6   :  { %1159 = vmatprep.mubr.bf16.mxu1 %v3982_v23  ;;  %1449 = vmatpush1.bf16.msra.mxu1 %v4012_v14  ;;  %v4052_v23 = vld [vmem:[#allocation5 + $0xf4] ss:$8 sps:$4 sm:$0xff]  }
  0xa7   :  { %1450 = vmatprep.subr.bf16.mxu1 %v4016_v15  ;;  %1311 = vmatprep.subr.bf16.mxu0 %v4052_v23 }
  0xa8   :  { %1312 = vmatpush1.bf16.msra.mxu0 %v4050_v22 }
  0xaa   :  { %1451 = vmatpush1.bf16.msra.mxu1 %v4020_v3 }
  0xab   :  { %1452 = vmatprep.subr.bf16.mxu1 %v4026_v8 }
  0xac   :  { %898 = vmatmul.mubr.bf16.gmra.mxu0 %v3987_v25 }
  0xad   :  { %1160 = vmatmul.mubr.bf16.gmra.mxu1 %v3987_v25  ;;  %1343 = vmatprep.mubr.bf16.mxu0 %v4728_v19  ;;  %v4057_v25 = vld [vmem:[#allocation5 + $0xe4] ss:$8 sps:$4 sm:$0xff]  }
  0xae   :  { %1476 = vmatprep.mubr.bf16.mxu1 %v4728_v19  ;;  %1453 = vmatpush1.bf16.msra.mxu1 %v4028_v16 }
  0xaf   :  { %1454 = vmatprep.subr.bf16.mxu1 %v4030_v17  ;;  %1313 = vmatprep.subr.bf16.mxu0 %v4057_v25 }
  0xb0   :  { %1314 = vmatpush1.bf16.msra.mxu0 %v4064_v27 }
  0xb1   :  { %1315 = vmatprep.subr.bf16.mxu0 %v4067_v28 }
  0xb2   :  { %1455 = vmatpush1.bf16.msra.mxu1 %v4036_v13 }
  0xb3   :  { %1456 = vmatprep.subr.bf16.mxu1 %v4038_v18 }
  0xb4   :  { %1316 = vmatpush1.bf16.msra.mxu0 %v4072_v29 }
  0xb5   :  { %1317 = vmatprep.subr.bf16.mxu0 %v4075_v30 }
  0xb6   :  { %1457 = vmatpush1.bf16.msra.mxu1 %v4044_v20 }
  0xb7   :  { %1458 = vmatprep.subr.bf16.mxu1 %v4048_v21 }
  0xb8   :  { %1318 = vmatpush1.bf16.msra.mxu0 %v4078_v31 }
  0xb9   :  { %1319 = vmatprep.subr.bf16.mxu0 %v4082_v32 }
  0xba   :  { %1459 = vmatpush1.bf16.msra.mxu1 %v4055_v24 }
  0xbb   :  { %1756 = vmatprep.subr.bf16.mxu1 %v4061_v26 }
  0xbc   :  { %1320 = vmatpush1.bf16.msra.mxu0 %v4084_v33 }
  0xbd   :  { %1321 = vmatprep.subr.bf16.mxu0 %v4088_v34 }
  0xc0   :  { %1322 = vmatpush1.bf16.msra.mxu0 %v4090_v35 }
  0xc1   :  { %1323 = vmatprep.subr.bf16.mxu0 %v4094_v36 }
  0xc4   :  { %1324 = vmatpush1.bf16.msra.mxu0 %v4096_v37 }
  0xc5   :  { %1325 = vmatprep.subr.bf16.mxu0 %v4100_v38 }
  0xc8   :  { %1326 = vmatpush1.bf16.msra.mxu0 %v4102_v39 }
  0xc9   :  { %1596 = vmatprep.subr.bf16.mxu0 %v4106_v40 }
 0x11c   :  { %v331_v41 = vpop.f32.mrf.mxu0 }
 0x11d   :  { %v593_v42 = vpop.f32.mrf.mxu1 }
 0x11e   :  { %v333_v43 = vpop.f32.mrf.mxu0 }
 0x11f   :  { %v595_v44 = vpop.f32.mrf.mxu1  ;;  %v360_v45 = vmax.f32 %v331_v41, %v333_v43 }
 0x120   :  { %v622_v46 = vmax.f32 %v593_v42, %v595_v44  ;;  %v335_v47 = vpop.f32.mrf.mxu0  ;;  %v4116_v42 = vld [vmem:[#allocation5 + $0x1f0] ss:$8 sps:$4 sm:$0xff]  }
 0x121   :  { %v597_v48 = vpop.f32.mrf.mxu1  ;;  %4747 = vst [vmem:[#allocation10_spill] sm:$0xff] %v4116_v42 }
 0x122   :  { %v628_v49 = vmax.f32 %v360_v45, %v622_v46  ;;  %v337_v51 = vpop.f32.mrf.mxu0 }
 0x123   :  { %v599_v52 = vpop.f32.mrf.mxu1  ;;  %v361_v53 = vmax.f32 %v335_v47, %v337_v51  ;;  %v4119_v47 = vld [vmem:[#allocation5 + $0x1e4] ss:$8 sps:$4 sm:$0xff]  }
 0x124   :  { %v623_v54 = vmax.f32 %v597_v48, %v599_v52  ;;  %v341_v55 = vpop.f32.mrf.mxu0  ;;  %v640_v57 = vadd.f32 %v4112_v50, %v628_v49  ;;  %4748 = vst [vmem:[#allocation11_spill] sm:$0xff] %v4119_v47 }
 0x125   :  { %v603_v56 = vpop.f32.mrf.mxu1 }
 0x126   :  { %v629_v58 = vmax.f32 %v361_v53, %v623_v54  ;;  %v343_v59 = vpop.f32.mrf.mxu0  ;;  %v646_v2 = vmax.f32 %v640_v57, 0.0 }
 0x127   :  { %v605_v60 = vpop.f32.mrf.mxu1  ;;  %v362_v62 = vmax.f32 %v341_v55, %v343_v59  ;;  %v4131_v55 = vld [vmem:[#allocation5 + $0x1e0] ss:$8 sps:$4 sm:$0xff]  }
 0x128   :  { %v641_v61 = vadd.f32 %v4112_v50, %v629_v58  ;;  %v624_v63 = vmax.f32 %v603_v56, %v605_v60  ;;  %v345_v0 = vpop.f32.mrf.mxu0  ;;  %4749 = vst [vmem:[#allocation12_spill] sm:$0xff] %v4131_v55  ;;  %v4139_v58 = vld [vmem:[#allocation5 + $0x1d4] ss:$8 sps:$4 sm:$0xff]  }
 0x129   :  { %v607_v1 = vpop.f32.mrf.mxu1  ;;  %4750 = vst [vmem:[#allocation13_spill] sm:$0xff] %v4139_v58 }
 0x12a   :  { %v647_v4 = vmax.f32 %v641_v61, 0.0  ;;  %v630_v5 = vmax.f32 %v362_v62, %v624_v63  ;;  %v347_v6 = vpop.f32.mrf.mxu0 }
 0x12b   :  { %v609_v41 = vpop.f32.mrf.mxu1  ;;  %v363_v45 = vmax.f32 %v345_v0, %v347_v6  ;;  %v4143_v0 = vld [vmem:[#allocation5 + $0x1d0] ss:$8 sps:$4 sm:$0xff]  }
 0x12c   :  { %v1194_v43 = vpack.c.bf16 %v647_v4, %v646_v2  ;;  %v642_v44 = vadd.f32 %v4112_v50, %v630_v5  ;;  %v625_v46 = vmax.f32 %v607_v1, %v609_v41  ;;  %v4121_v48 = vpop.f32.mrf.mxu0  ;;  %4751 = vst [vmem:[#allocation14_spill] sm:$0xff] %v4143_v0  ;;  %v4150_v5 = vld [vmem:[#allocation5 + $0x1c4] ss:$8 sps:$4 sm:$0xff]   ;;  %v4156_v41 = vld [vmem:[#allocation5 + $0x1c0] ss:$8 sps:$4 sm:$0xff]  }
 0x12d   :  { %v4123_v49 = vpop.f32.mrf.mxu1  ;;  %4752 = vst [vmem:[#allocation15_spill] sm:$0xff] %v4150_v5  ;;  %4753 = vst [vmem:[#allocation16_spill] sm:$0xff] %v4156_v41 }
 0x12e   :  { %v648_v51 = vmax.f32 %v642_v44, 0.0  ;;  %1477 = vmatmul.mubr.bf16.vlgmr.msra.gmra.mxu1 %v1194_v43  ;;  %v631_v52 = vmax.f32 %v363_v45, %v625_v46  ;;  %v4125_v53 = vpop.f32.mrf.mxu0  ;;  %v4160_v43 = vld [vmem:[#allocation5 + $0x1b4] ss:$8 sps:$4 sm:$0xff]   ;;  %v4163_v44 = vld [vmem:[#allocation5 + $0x1b0] ss:$8 sps:$4 sm:$0xff]  }
 0x12f   :  { %v4127_v54 = vpop.f32.mrf.mxu1  ;;  %1486 = vmatprep.mubr.bf16.mxu1 %v4728_v19  ;;  %1757 = vmatpush1.bf16.msra.mxu1 %v4116_v42  ;;  %4754 = vst [vmem:[#allocation17_spill] sm:$0xff] %v4160_v43  ;;  %4755 = vst [vmem:[#allocation18_spill] sm:$0xff] %v4163_v44  ;;  %v4166_v45 = vld [vmem:[#allocation5 + $0x1a4] ss:$8 sps:$4 sm:$0xff]   ;;  %v4169_v46 = vld [vmem:[#allocation5 + $0x1a0] ss:$8 sps:$4 sm:$0xff]  }
 0x130   :  { %v4133_v56 = vpack.c.bf16 %v648_v51, %v647_v4  ;;  %v4136_v57 = vadd.f32 %v4112_v50, %v631_v52  ;;  %1758 = vmatprep.subr.bf16.mxu1 %v4119_v47  ;;  %v355_v59 = vpop.f32.mrf.mxu0  ;;  %4756 = vst [vmem:[#allocation19_spill] sm:$0xff] %v4166_v45  ;;  %4757 = vst [vmem:[#allocation20_spill] sm:$0xff] %v4169_v46  ;;  %v4175_v52 = vld [vmem:[#allocation5 + $0x190] ss:$8 sps:$4 sm:$0xff]  }
 0x131   :  { %v617_v60 = vpop.f32.mrf.mxu1  ;;  %4759 = vst [vmem:[#allocation22_spill] sm:$0xff] %v4175_v52 }
 0x132   :  { %v4727_v61 = vmax.f32 %v4136_v57, 0.0  ;;  %v357_v62 = vpop.f32.mrf.mxu0 }
 0x133   :  { %v619_v63 = vpop.f32.mrf.mxu1  ;;  %1759 = vmatpush1.bf16.msra.mxu1 %v4131_v55  ;;  %v365_v2 = vmax.f32 %v355_v59, %v357_v62  ;;  %v4178_v59 = vld [vmem:[#allocation5 + $0x184] ss:$8 sps:$4 sm:$0xff]  }
 0x134   :  { %v4147_v1 = vpack.c.bf16 %v4727_v61, %v648_v51  ;;  %v627_v4 = vmax.f32 %v617_v60, %v619_v63  ;;  %1760 = vmatprep.subr.bf16.mxu1 %v4139_v58  ;;  %v4172_v51 = vld [vmem:[#allocation5 + $0x194] ss:$8 sps:$4 sm:$0xff]   ;;  %4760 = vst [vmem:[#allocation23_spill] sm:$0xff] %v4178_v59  ;;  %v4181_v60 = vld [vmem:[#allocation5 + $0x180] ss:$8 sps:$4 sm:$0xff]  }
 0x135   :  { %4758 = vst [vmem:[#allocation21_spill] sm:$0xff] %v4172_v51  ;;  %4761 = vst [vmem:[#allocation24_spill] sm:$0xff] %v4181_v60 }
 0x136   :  { %1487 = vmatmul.mubr.bf16.gmra.mxu1 %v4147_v1  ;;  %v4153_v6 = vmax.f32 %v365_v2, %v627_v4 }
 0x137   :  { %1761 = vmatpush1.bf16.msra.mxu1 %v4143_v0  ;;  %1788 = vmatprep.mubr.bf16.mxu1 %v4728_v19 }
 0x138   :  { %1762 = vmatprep.subr.bf16.mxu1 %v4150_v5 }
 0x13b   :  { %1763 = vmatpush1.bf16.msra.mxu1 %v4156_v41 }
 0x13c   :  { %1764 = vmatprep.subr.bf16.mxu1 %v4160_v43 }
 0x13f   :  { %1765 = vmatpush1.bf16.msra.mxu1 %v4163_v44 }
 0x140   :  { %1766 = vmatprep.subr.bf16.mxu1 %v4166_v45 }
 0x143   :  { %1767 = vmatpush1.bf16.msra.mxu1 %v4169_v46 }
 0x144   :  { %1768 = vmatprep.subr.bf16.mxu1 %v4172_v51 }
 0x147   :  { %1769 = vmatpush1.bf16.msra.mxu1 %v4175_v52 }
 0x148   :  { %1770 = vmatprep.subr.bf16.mxu1 %v4178_v59 }
 0x14b   :  { %1771 = vmatpush1.bf16.msra.mxu1 %v4181_v60 }
 0x14c   :  { %1980 = vmatprep.subr.bf16.mxu1 %v4052_v23 }
 0x15c   :  { %v879_v62 = vpop.f32.mrf.mxu0 }
 0x15d   :  { %v1141_v63 = vpop.f32.mrf.mxu1 }
 0x15e   :  { %v881_v2 = vpop.f32.mrf.mxu0 }
 0x15f   :  { %v1143_v4 = vpop.f32.mrf.mxu1  ;;  %v908_v61 = vmax.f32 %v879_v62, %v881_v2 }
 0x160   :  { %v1170_v19 = vmax.f32 %v1141_v63, %v1143_v4  ;;  %v883_v46 = vpop.f32.mrf.mxu0 }
 0x161   :  { %v1145_v51 = vpop.f32.mrf.mxu1 }
 0x162   :  { %v1176_v45 = vmax.f32 %v908_v61, %v1170_v19  ;;  %v885_v44 = vpop.f32.mrf.mxu0 }
 0x163   :  { %v1147_v43 = vpop.f32.mrf.mxu1  ;;  %v909_v52 = vmax.f32 %v883_v46, %v885_v44  ;;  %v4188_v44 = vld [vmem:[#allocation5 + $0x170] ss:$8 sps:$4 sm:$0xff]  }
 0x164   :  { %v1171_v41 = vmax.f32 %v1145_v51, %v1147_v43  ;;  %v889_v5 = vpop.f32.mrf.mxu0  ;;  %v1182_v59 = vadd.f32 %v4112_v50, %v1176_v45  ;;  %v4193_v51 = vld [vmem:[#allocation5 + $0x164] ss:$8 sps:$4 sm:$0xff]  }
 0x165   :  { %v1151_v0 = vpop.f32.mrf.mxu1 }
 0x166   :  { %v1177_v60 = vmax.f32 %v909_v52, %v1171_v41  ;;  %v891_v58 = vpop.f32.mrf.mxu0  ;;  %v1188_v2 = vmax.f32 %v1182_v59, 0.0  ;;  %v4762_v59 = vmov 0  }
 0x167   :  { %v1153_v23 = vpop.f32.mrf.mxu1  ;;  %v910_v47 = vmax.f32 %v889_v5, %v891_v58 }
 0x168   :  { %v1183_v55 = vadd.f32 %v4112_v50, %v1177_v60  ;;  %v1172_v42 = vmax.f32 %v1151_v0, %v1153_v23  ;;  %v893_v62 = vpop.f32.mrf.mxu0 }
 0x169   :  { %v1155_v63 = vpop.f32.mrf.mxu1 }
 0x16a   :  { %v1189_v4 = vmax.f32 %v1183_v55, 0.0  ;;  %v1178_v19 = vmax.f32 %v910_v47, %v1172_v42  ;;  %v895_v61 = vpop.f32.mrf.mxu0  ;;  %v4197_v55 = vld [vmem:[#allocation5 + $0x160] ss:$8 sps:$4 sm:$0xff]  }
 0x16b   :  { %v1157_v26 = vpop.f32.mrf.mxu1  ;;  %v911_v41 = vmax.f32 %v893_v62, %v895_v61  ;;  %v4209_v61 = vld [vmem:[#allocation5 + $0x150] ss:$8 sps:$4 sm:$0xff]  }
 0x16c   :  { %v4190_v43 = vpack.c.bf16 %v1189_v4, %v1188_v2  ;;  %v1184_v45 = vadd.f32 %v4112_v50, %v1178_v19  ;;  %v1173_v46 = vmax.f32 %v1155_v63, %v1157_v26  ;;  %v899_v52 = vpop.f32.mrf.mxu0  ;;  %v4204_v63 = vld [vmem:[#allocation5 + $0x154] ss:$8 sps:$4 sm:$0xff]  }
 0x16d   :  { %v1161_v58 = vpop.f32.mrf.mxu1 }
 0x16e   :  { %v1190_v0 = vmax.f32 %v1184_v45, 0.0  ;;  %v1179_v5 = vmax.f32 %v911_v41, %v1173_v46  ;;  %1344 = vmatmul.mubr.bf16.vlgmr.msra.gmra.mxu0 %v4190_v43  ;;  %v901_v42 = vpop.f32.mrf.mxu0  ;;  %v4218_v41 = vld [vmem:[#allocation5 + $0x144] ss:$8 sps:$4 sm:$0xff]  }
 0x16f   :  { %1597 = vmatpush1.bf16.msra.mxu0 %v4188_v44  ;;  %v1163_v47 = vpop.f32.mrf.mxu1  ;;  %1353 = vmatprep.mubr.bf16.mxu0 %v4762_v59  ;;  %v912_v23 = vmax.f32 %v899_v52, %v901_v42  ;;  %v4233_v52 = vld [vmem:[#allocation5 + $0x134] ss:$8 sps:$4 sm:$0xff]   ;;  %v3777_v42 = vld [vmem:[#allocation5 + $0x220] ss:$8 sps:$4 sm:$0xff]  }
 0x170   :  { %v4200_v60 = vpack.c.bf16 %v1190_v0, %v1189_v4  ;;  %v1185_v26 = vadd.f32 %v4112_v50, %v1179_v5  ;;  %v1174_v62 = vmax.f32 %v1161_v58, %v1163_v47  ;;  %1598 = vmatprep.subr.bf16.mxu0 %v4193_v51  ;;  %v4248_v58 = vld [vmem:[#allocation5 + $0x120] ss:$8 sps:$4 sm:$0xff]   ;;  %v4264_v5 = vld [vmem:[#allocation5 + $0x104] ss:$8 sps:$4 sm:$0xff]   ;;  %v3782_v47 = vld [vmem:[#allocation5 + $0x214] ss:$8 sps:$4 sm:$0xff]  }
 0x172   :  { %v1191_v2 = vmax.f32 %v1185_v26, 0.0  ;;  %v1180_v19 = vmax.f32 %v912_v23, %v1174_v62  ;;  %1789 = vmatmul.mubr.bf16.vlgmr.msra.gmra.mxu1 %v4200_v60  ;;  %v3785_v26 = vld [vmem:[#allocation5 + $0x204] ss:$8 sps:$4 sm:$0xff]   ;;  %v3783_v23 = vld [vmem:[#allocation5 + $0x200] ss:$8 sps:$4 sm:$0xff]   ;;  %v645_v62 = vadd.f32 %v4112_v50, %v4153_v6 }
 0x173   :  { %1599 = vmatpush1.bf16.msra.mxu0 %v4197_v55  ;;  %1981 = vmatpush1.bf16.msra.mxu1 %v4050_v22  ;;  %v4225_v22 = vld [vmem:[#allocation5 + $0x140] ss:$8 sps:$4 sm:$0xff]  }
 0x174   :  { %v4212_v4 = vadd.f32 %v4112_v50, %v1180_v19  ;;  %1600 = vmatprep.subr.bf16.mxu0 %v4204_v63  ;;  %1982 = vmatprep.subr.bf16.mxu1 %v4057_v25  ;;  %v4216_v45 = vpack.c.bf16 %v1191_v2, %v1190_v0  ;;  %v364_v0 = vmax.f32 %v4121_v48, %v4125_v53  ;;  %v4272_v48 = vld [vmem:[#allocation5 + $0x274] ss:$8 sps:$4 sm:$0xff]  }
 0x175   :  { %1798 = vmatprep.mubr.bf16.mxu1 %v4762_v59  ;;  %v4293_v53 = vld [vmem:[#allocation5 + $0x254] ss:$8 sps:$4 sm:$0xff]  }
 0x176   :  { %v1192_v46 = vmax.f32 %v4212_v4, 0.0  ;;  %1354 = vmatmul.mubr.bf16.gmra.mxu0 %v4216_v45  ;;  %v4774_v19 = vld [vmem:[#allocation19_spill] sm:$0xff]  ;;  %v3786_v4 = vld [vmem:[%s4720_s5 + $0x38] sm:$0xff]  }
 0x177   :  { %1601 = vmatpush1.bf16.msra.mxu0 %v4209_v61  ;;  %1983 = vmatpush1.bf16.msra.mxu1 %v4064_v27  ;;  %v4239_v27 = vld [vmem:[#allocation5 + $0x130] ss:$8 sps:$4 sm:$0xff]  }
 0x178   :  { %1602 = vmatprep.subr.bf16.mxu0 %v4218_v41  ;;  %1984 = vmatprep.subr.bf16.mxu1 %v4067_v28  ;;  %v4231_v25 = vpack.c.bf16 %v1192_v46, %v1191_v2  ;;  %v4243_v28 = vld [vmem:[#allocation5 + $0x124] ss:$8 sps:$4 sm:$0xff]  }
 0x179   :  { %1628 = vmatprep.mubr.bf16.mxu0 %v4762_v59  ;;  %v4773_v2 = vld [vmem:[#allocation18_spill] sm:$0xff] }
 0x17a   :  { %1799 = vmatmul.mubr.bf16.gmra.mxu1 %v4231_v25 }
 0x17b   :  { %1603 = vmatpush1.bf16.msra.mxu0 %v4225_v22  ;;  %1985 = vmatpush1.bf16.msra.mxu1 %v4072_v29  ;;  %v4252_v29 = vld [vmem:[#allocation5 + $0x114] ss:$8 sps:$4 sm:$0xff]  }
 0x17c   :  { %1604 = vmatprep.subr.bf16.mxu0 %v4233_v52  ;;  %1986 = vmatprep.subr.bf16.mxu1 %v4075_v30  ;;  %v4256_v30 = vld [vmem:[#allocation5 + $0x110] ss:$8 sps:$4 sm:$0xff]  }
 0x17d   :  { %2012 = vmatprep.mubr.bf16.mxu1 %v4762_v59 }
 0x17f   :  { %1605 = vmatpush1.bf16.msra.mxu0 %v4239_v27  ;;  %1987 = vmatpush1.bf16.msra.mxu1 %v4078_v31  ;;  %v626_v31 = vmax.f32 %v4123_v49, %v4127_v54 }
 0x180   :  { %1606 = vmatprep.subr.bf16.mxu0 %v4243_v28  ;;  %1988 = vmatprep.subr.bf16.mxu1 %v4082_v32  ;;  %v4268_v32 = vld [vmem:[#allocation5 + $0x100] ss:$8 sps:$4 sm:$0xff]  }
 0x183   :  { %1607 = vmatpush1.bf16.msra.mxu0 %v4248_v58  ;;  %1989 = vmatpush1.bf16.msra.mxu1 %v4084_v33  ;;  %v632_v33 = vmax.f32 %v364_v0, %v626_v31  ;;  %v3793_v31 = vld [vmem:[%s4720_s5 + $0x60] sm:$0xff]  }
 0x184   :  { %1608 = vmatprep.subr.bf16.mxu0 %v4252_v29  ;;  %1990 = vmatprep.subr.bf16.mxu1 %v4088_v34  ;;  %v4276_v34 = vld [vmem:[#allocation5 + $0x270] ss:$8 sps:$4 sm:$0xff]  }
 0x185   :  { %v4279_v49 = vadd.f32 %v4112_v50, %v632_v33 }
 0x187   :  { %1609 = vmatpush1.bf16.msra.mxu0 %v4256_v30  ;;  %1991 = vmatpush1.bf16.msra.mxu1 %v4090_v35  ;;  %v4283_v35 = vld [vmem:[#allocation5 + $0x264] ss:$8 sps:$4 sm:$0xff]  }
 0x188   :  { %1610 = vmatprep.subr.bf16.mxu0 %v4264_v5  ;;  %1992 = vmatprep.subr.bf16.mxu1 %v4094_v36  ;;  %v4288_v36 = vld [vmem:[#allocation5 + $0x260] ss:$8 sps:$4 sm:$0xff]  }
 0x18b   :  { %1611 = vmatpush1.bf16.msra.mxu0 %v4268_v32  ;;  %1993 = vmatpush1.bf16.msra.mxu1 %v4096_v37  ;;  %v650_v37 = vmax.f32 %v4279_v49, 0.0  ;;  %v3795_v49 = vld [vmem:[%s4720_s5 + $0x58] sm:$0xff]  }
 0x18c   :  { %1915 = vmatprep.subr.bf16.mxu0 %v4272_v48  ;;  %1994 = vmatprep.subr.bf16.mxu1 %v4100_v38  ;;  %v4299_v38 = vld [vmem:[#allocation5 + $0x250] ss:$8 sps:$4 sm:$0xff]  }
 0x18e   :  { %1629 = vmatmul.mubr.bf16.vlgmr.msra.gmra.mxu0 %v4133_v56 }
 0x18f   :  { %1916 = vmatpush1.bf16.msra.mxu0 %v4276_v34  ;;  %1995 = vmatpush1.bf16.msra.mxu1 %v4102_v39  ;;  %v4763_v39 = vmax.f32 %v4136_v57, 0.0  ;;  %v3776_v57 = vld [vmem:[#allocation5 + $0x234] ss:$8 sps:$4 sm:$0xff]  }
 0x190   :  { %1917 = vmatprep.subr.bf16.mxu0 %v4283_v35  ;;  %2086 = vmatprep.subr.bf16.mxu1 %v4106_v40  ;;  %v4305_v40 = vld [vmem:[#allocation5 + $0x244] ss:$8 sps:$4 sm:$0xff]  }
 0x191   :  { %1638 = vmatprep.mubr.bf16.mxu0 %v4762_v59  ;;  %v1498_v54 = vpack.c.bf16 %v650_v37, %v4763_v39  ;;  %v3798_v39 = vld [vmem:[%s4720_s5 + $0x8] sm:$0xff]  }
 0x192   :  { %2013 = vmatmul.mubr.bf16.vlgmr.msra.gmra.mxu1 %v4133_v56  ;;  %v3771_v56 = vld [vmem:[#allocation5 + $0x240] ss:$8 sps:$4 sm:$0xff]  }
 0x193   :  { %1918 = vmatpush1.bf16.msra.mxu0 %v4288_v36  ;;  %2087 = vmatpush1.bf16.msra.mxu1 %v4188_v44  ;;  %v3774_v44 = vld [vmem:[#allocation5 + $0x230] ss:$8 sps:$4 sm:$0xff]  }
 0x194   :  { %1919 = vmatprep.subr.bf16.mxu0 %v4293_v53  ;;  %2088 = vmatprep.subr.bf16.mxu1 %v4193_v51  ;;  %v3779_v51 = vld [vmem:[#allocation5 + $0x224] ss:$8 sps:$4 sm:$0xff]  }
 0x195   :  { %2022 = vmatprep.mubr.bf16.mxu1 %v4762_v59 }
 0x196   :  { %1639 = vmatmul.mubr.bf16.gmra.mxu0 %v1498_v54 }
 0x197   :  { %1920 = vmatpush1.bf16.msra.mxu0 %v4299_v38  ;;  %2089 = vmatpush1.bf16.msra.mxu1 %v4197_v55  ;;  %v3780_v55 = vld [vmem:[#allocation5 + $0x210] ss:$8 sps:$4 sm:$0xff]  }
 0x198   :  { %1921 = vmatprep.subr.bf16.mxu0 %v4305_v40  ;;  %2090 = vmatprep.subr.bf16.mxu1 %v4204_v63  ;;  %v651_v63 = vmax.f32 %v645_v62, 0.0 }
 0x199   :  { %1947 = vmatprep.mubr.bf16.mxu0 %v4762_v59 }
 0x19a   :  { %2023 = vmatmul.mubr.bf16.gmra.mxu1 %v1498_v54 }
 0x19b   :  { %1922 = vmatpush1.bf16.msra.mxu0 %v3771_v56  ;;  %2091 = vmatpush1.bf16.msra.mxu1 %v4209_v61  ;;  %v4775_v61 = vld [vmem:[#allocation20_spill] sm:$0xff] }
 0x19c   :  { %1923 = vmatprep.subr.bf16.mxu0 %v3776_v57  ;;  %2092 = vmatprep.subr.bf16.mxu1 %v4218_v41  ;;  %v4777_v41 = vld [vmem:[#allocation22_spill] sm:$0xff] }
 0x19d   :  { %2118 = vmatprep.mubr.bf16.mxu1 %v4762_v59 }
 0x19f   :  { %1924 = vmatpush1.bf16.msra.mxu0 %v3774_v44  ;;  %2093 = vmatpush1.bf16.msra.mxu1 %v4225_v22  ;;  %v4778_v22 = vld [vmem:[#allocation23_spill] sm:$0xff] }
 0x1a0   :  { %1925 = vmatprep.subr.bf16.mxu0 %v3779_v51  ;;  %2094 = vmatprep.subr.bf16.mxu1 %v4233_v52 }
 0x1a3   :  { %1926 = vmatpush1.bf16.msra.mxu0 %v3777_v42  ;;  %2095 = vmatpush1.bf16.msra.mxu1 %v4239_v27  ;;  %v3789_v27 = vld [vmem:[%s4720_s5 + $0x70] sm:$0xff]  }
 0x1a4   :  { %1927 = vmatprep.subr.bf16.mxu0 %v3782_v47  ;;  %2096 = vmatprep.subr.bf16.mxu1 %v4243_v28  ;;  %v3790_v28 = vld [vmem:[%s4720_s5 + $0x28] sm:$0xff]  }
 0x1a7   :  { %1928 = vmatpush1.bf16.msra.mxu0 %v3780_v55  ;;  %2097 = vmatpush1.bf16.msra.mxu1 %v4248_v58 }
 0x1a8   :  { %1929 = vmatprep.subr.bf16.mxu0 %v3785_v26  ;;  %2098 = vmatprep.subr.bf16.mxu1 %v4252_v29  ;;  %v3791_v29 = vld [vmem:[%s4720_s5 + $0x68] sm:$0xff]  }
 0x1ab   :  { %1930 = vmatpush1.bf16.msra.mxu0 %v3783_v23  ;;  %2099 = vmatpush1.bf16.msra.mxu1 %v4256_v30  ;;  %v3792_v30 = vld [vmem:[%s4720_s5 + $0x20] sm:$0xff]  }
 0x1ac   :  { %2033 = vmatprep.subr.bf16.mxu0 %v3995_v7  ;;  %2100 = vmatprep.subr.bf16.mxu1 %v4264_v5  ;;  %v4336_v7 = vpack.c.bf16 %v651_v63, %v650_v37  ;;  %v3794_v5 = vld [vmem:[%s4720_s5 + $0x18] sm:$0xff]   ;;  %v3801_v63 = vld [vmem:[%s4720_s5 + $0x40] sm:$0xff]  }
 0x1ae   :  { %1948 = vmatmul.mubr.bf16.vlgmr.msra.gmra.mxu0 %v4147_v1 }
 0x1af   :  { %2034 = vmatpush1.bf16.msra.mxu0 %v3997_v9  ;;  %2101 = vmatpush1.bf16.msra.mxu1 %v4268_v32  ;;  %v903_v9 = vpop.f32.mrf.mxu0 }
 0x1b0   :  { %2035 = vmatprep.subr.bf16.mxu0 %v4000_v10  ;;  %2209 = vmatprep.subr.bf16.mxu1 %v4272_v48  ;;  %v1165_v10 = vpop.f32.mrf.mxu1 }
 0x1b1   :  { %1957 = vmatprep.mubr.bf16.mxu0 %v4762_v59 }
 0x1b2   :  { %2119 = vmatmul.mubr.bf16.vlgmr.msra.gmra.mxu1 %v4200_v60  ;;  %v4772_v60 = vld [vmem:[#allocation17_spill] sm:$0xff] }
 0x1b3   :  { %2036 = vmatpush1.bf16.msra.mxu0 %v4004_v11  ;;  %2210 = vmatpush1.bf16.msra.mxu1 %v4276_v34  ;;  %v905_v11 = vpop.f32.mrf.mxu0 }
 0x1b4   :  { %2037 = vmatprep.subr.bf16.mxu0 %v4010_v12  ;;  %2211 = vmatprep.subr.bf16.mxu1 %v4283_v35  ;;  %v1167_v12 = vpop.f32.mrf.mxu1  ;;  %v3796_v35 = vld [vmem:[%s4720_s5 + $0x10] sm:$0xff]  }
 0x1b5   :  { %2128 = vmatprep.mubr.bf16.mxu1 %v4762_v59 }
 0x1b6   :  { %1958 = vmatmul.mubr.bf16.gmra.mxu0 %v4336_v7 }
 0x1b7   :  { %2038 = vmatpush1.bf16.msra.mxu0 %v4012_v14  ;;  %2212 = vmatpush1.bf16.msra.mxu1 %v4288_v36  ;;  %v913_v14 = vmax.f32 %v903_v9, %v905_v11 }
 0x1b8   :  { %2039 = vmatprep.subr.bf16.mxu0 %v4016_v15  ;;  %2213 = vmatprep.subr.bf16.mxu1 %v4293_v53  ;;  %v1175_v15 = vmax.f32 %v1165_v10, %v1167_v12 }
 0x1b9   :  { %2065 = vmatprep.mubr.bf16.mxu0 %v4762_v59 }
 0x1ba   :  { %2129 = vmatmul.mubr.bf16.gmra.mxu1 %v4231_v25  ;;  %v4779_v25 = vld [vmem:[#allocation24_spill] sm:$0xff] }
 0x1bb   :  { %2040 = vmatpush1.bf16.msra.mxu0 %v4020_v3  ;;  %2214 = vmatpush1.bf16.msra.mxu1 %v4299_v38  ;;  %v1181_v3 = vmax.f32 %v913_v14, %v1175_v15  ;;  %v3797_v38 = vld [vmem:[%s4720_s5 + $0x50] sm:$0xff]  }
 0x1bc   :  { %2041 = vmatprep.subr.bf16.mxu0 %v4026_v8  ;;  %2215 = vmatprep.subr.bf16.mxu1 %v4305_v40  ;;  %v4764_v8 = vld [vmem:[#allocation9_spill] sm:$0xff] }
 0x1bd   :  { %2241 = vmatprep.mubr.bf16.mxu1 %v4762_v59 }
 0x1bf   :  { %2042 = vmatpush1.bf16.msra.mxu0 %v4028_v16  ;;  %2216 = vmatpush1.bf16.msra.mxu1 %v3771_v56  ;;  %v4765_v16 = vld [vmem:[#allocation10_spill] sm:$0xff] }
 0x1c0   :  { %2043 = vmatprep.subr.bf16.mxu0 %v4030_v17  ;;  %2217 = vmatprep.subr.bf16.mxu1 %v3776_v57  ;;  %v1187_v17 = vadd.f32 %v4112_v50, %v1181_v3  ;;  %v4770_v50 = vld [vmem:[#allocation15_spill] sm:$0xff] }
 0x1c3   :  { %2044 = vmatpush1.bf16.msra.mxu0 %v4036_v13  ;;  %2218 = vmatpush1.bf16.msra.mxu1 %v3774_v44  ;;  %v4766_v13 = vld [vmem:[#allocation11_spill] sm:$0xff] }
 0x1c4   :  { %2045 = vmatprep.subr.bf16.mxu0 %v4038_v18  ;;  %2219 = vmatprep.subr.bf16.mxu1 %v3779_v51  ;;  %v4767_v18 = vld [vmem:[#allocation12_spill] sm:$0xff]  ;;  %v3799_v51 = vld [vmem:[%s4720_s5 + $0x48] sm:$0xff]  }
 0x1c7   :  { %2046 = vmatpush1.bf16.msra.mxu0 %v4044_v20  ;;  %2220 = vmatpush1.bf16.msra.mxu1 %v3777_v42  ;;  %v1193_v20 = vmax.f32 %v1187_v17, 0.0  ;;  %v3800_v42 = vld [vmem:[%s4720_s5] sm:$0xff]  }
 0x1c8   :  { %2047 = vmatprep.subr.bf16.mxu0 %v4048_v21  ;;  %2221 = vmatprep.subr.bf16.mxu1 %v3782_v47  ;;  %v4768_v21 = vld [vmem:[#allocation13_spill] sm:$0xff] }
 0x1c9   :  { %v2208_v6 = vpack.c.bf16 %v1193_v20, %v1192_v46  ;;  %v3883_v46 = vmov 0.0  }
 0x1cb   :  { %2048 = vmatpush1.bf16.msra.mxu0 %v4055_v24  ;;  %2222 = vmatpush1.bf16.msra.mxu1 %v3780_v55  ;;  %v4769_v24 = vld [vmem:[#allocation14_spill] sm:$0xff] }
 0x1cc   :  { %2147 = vmatprep.subr.bf16.mxu0 %v4764_v8  ;;  %2223 = vmatprep.subr.bf16.mxu1 %v3785_v26 }
 0x1ce   :  { %2066 = vmatmul.mubr.bf16.vlgmr.msra.gmra.mxu0 %v4190_v43  ;;  %v4771_v43 = vld [vmem:[#allocation16_spill] sm:$0xff] }
 0x1cf   :  { %2148 = vmatpush1.bf16.msra.mxu0 %v4765_v16  ;;  %2224 = vmatpush1.bf16.msra.mxu1 %v3783_v23 }
 0x1d0   :  { %2149 = vmatprep.subr.bf16.mxu0 %v4766_v13  ;;  %2075 = vmatprep.mubr.bf16.mxu0 %v4762_v59 }
 0x1d1   :  { %3358 = vmatprep.subr.bf16.mxu1 %v3883_v46 }
 0x1d2   :  { %2242 = vmatmul.mubr.bf16.vlgmr.msra.gmra.mxu1 %v4216_v45 }
 0x1d3   :  { %2150 = vmatpush1.bf16.msra.mxu0 %v4767_v18  ;;  %2251 = vmatprep.mubr.bf16.mxu1 %v4762_v59 }
 0x1d4   :  { %2151 = vmatprep.subr.bf16.mxu0 %v4768_v21  ;;  %3359 = vmatpush3.bf16.msra.mxu1 %v3786_v4 }
 0x1d5   :  { %3360 = vmatprep.subr.bf16.mxu1 %v3883_v46 }
 0x1d6   :  { %2076 = vmatmul.mubr.bf16.gmra.mxu0 %v4216_v45  ;;  %v4776_v45 = vld [vmem:[#allocation21_spill] sm:$0xff] }
 0x1d7   :  { %2152 = vmatpush1.bf16.msra.mxu0 %v4769_v24  ;;  %2179 = vmatprep.mubr.bf16.mxu0 %v4762_v59 }
 0x1d8   :  { %2153 = vmatprep.subr.bf16.mxu0 %v4770_v50 }
 0x1da   :  { %2252 = vmatmul.mubr.bf16.gmra.mxu1 %v2208_v6 }
 0x1db   :  { %2154 = vmatpush1.bf16.msra.mxu0 %v4771_v43  ;;  %3374 = vmatprep.mubr.msk.bf16.mxu1 %vm3884_vm0, %v3883_v46 }
 0x1dc   :  { %2155 = vmatprep.subr.bf16.mxu0 %v4772_v60 }
 0x1df   :  { %2156 = vmatpush1.bf16.msra.mxu0 %v4773_v2 }
 0x1e0   :  { %2157 = vmatprep.subr.bf16.mxu0 %v4774_v19 }
 0x1e3   :  { %2158 = vmatpush1.bf16.msra.mxu0 %v4775_v61 }
 0x1e4   :  { %2159 = vmatprep.subr.bf16.mxu0 %v4776_v45 }
 0x1e7   :  { %2160 = vmatpush1.bf16.msra.mxu0 %v4777_v41 }
 0x1e8   :  { %2161 = vmatprep.subr.bf16.mxu0 %v4778_v22 }
 0x1eb   :  { %2162 = vmatpush1.bf16.msra.mxu0 %v4779_v25 }
 0x1ec   :  { %3338 = vmatprep.subr.bf16.mxu0 %v3883_v46 }
 0x1ee   :  { %2180 = vmatmul.mubr.bf16.vlgmr.msra.gmra.mxu0 %v4147_v1  ;;  %v3787_v1 = vld [vmem:[%s4720_s5 + $0x78] sm:$0xff]   ;;  %v4400_v52 = vpop.f32.mrf.mxu1 }
 0x1ef   :  { %2189 = vmatprep.mubr.bf16.mxu0 %v4762_v59  ;;  %v3788_v59 = vld [vmem:[%s4720_s5 + $0x30] sm:$0xff]   ;;  %3339 = vmatpush3.bf16.msra.mxu0 %v3787_v1 }
 0x1f0   :  { %3361 = vmatpush3.bf16.msra.mxu1 %v3788_v59  ;;  %3340 = vmatprep.subr.bf16.mxu0 %v3883_v46  ;;  %v4410_v58 = vpop.f32.mrf.mxu1 }
 0x1f1   :  { %3362 = vmatprep.subr.bf16.mxu1 %v3883_v46 }
 0x1f2   :  { %v4420_v0 = vpop.f32.mrf.mxu1 }
 0x1f3   :  { %3341 = vmatpush3.bf16.msra.mxu0 %v3789_v27 }
 0x1f4   :  { %3363 = vmatpush3.bf16.msra.mxu1 %v3790_v28  ;;  %3342 = vmatprep.subr.bf16.mxu0 %v3883_v46  ;;  %v4430_v32 = vpop.f32.mrf.mxu1 }
 0x1f5   :  { %3364 = vmatprep.subr.bf16.mxu1 %v3883_v46 }
 0x1f6   :  { %2190 = vmatmul.mubr.bf16.gmra.mxu0 %v4336_v7  ;;  %v1488_v48 = vpop.f32.mrf.mxu1 }
 0x1f7   :  { %3343 = vmatpush3.bf16.msra.mxu0 %v3791_v29  ;;  %3354 = vmatprep.mubr.msk.bf16.mxu0 %vm3884_vm0, %v3883_v46 }
 0x1f8   :  { %3365 = vmatpush3.bf16.msra.mxu1 %v3792_v30  ;;  %3344 = vmatprep.subr.bf16.mxu0 %v3883_v46  ;;  %v1490_v37 = vpop.f32.mrf.mxu1 }
 0x1f9   :  { %3366 = vmatprep.subr.bf16.mxu1 %v3883_v46 }
 0x1fa   :  { %v1492_v56 = vpop.f32.mrf.mxu1 }
 0x1fb   :  { %3345 = vmatpush3.bf16.msra.mxu0 %v3793_v31 }
 0x1fc   :  { %3367 = vmatpush3.bf16.msra.mxu1 %v3794_v5  ;;  %3346 = vmatprep.subr.bf16.mxu0 %v3883_v46  ;;  %v1494_v26 = vpop.f32.mrf.mxu1 }
 0x1fd   :  { %3368 = vmatprep.subr.bf16.mxu1 %v3883_v46 }
 0x1ff   :  { %3347 = vmatpush3.bf16.msra.mxu0 %v3795_v49 }
 0x200   :  { %3369 = vmatpush3.bf16.msra.mxu1 %v3796_v35  ;;  %3348 = vmatprep.subr.bf16.mxu0 %v3883_v46 }
 0x201   :  { %3370 = vmatprep.subr.bf16.mxu1 %v3883_v46 }
 0x203   :  { %3349 = vmatpush3.bf16.msra.mxu0 %v3797_v38 }
 0x204   :  { %3371 = vmatpush3.bf16.msra.mxu1 %v3798_v39  ;;  %3350 = vmatprep.subr.bf16.mxu0 %v3883_v46 }
 0x205   :  { %3372 = vmatprep.subr.bf16.mxu1 %v3883_v46 }
 0x207   :  { %3351 = vmatpush3.bf16.msra.mxu0 %v3799_v51 }
 0x208   :  { %3373 = vmatpush3.bf16.msra.mxu1 %v3800_v42  ;;  %3352 = vmatprep.subr.bf16.mxu0 %v3883_v46 }
 0x209   :  { %3398 = vmatprep.subr.bf16.mxu1 %v3883_v46 }
 0x20b   :  { %3353 = vmatpush3.bf16.msra.mxu0 %v3801_v63 }
 0x20c   :  { %3378 = vmatprep.subr.bf16.mxu0 %v3883_v46 }
 0x22e   :  { %v4432_v33 = vpop.f32.mrf.mxu0 }
 0x230   :  { %v4434_v34 = vpop.f32.mrf.mxu0 }
 0x232   :  { %v4444_v36 = vpop.f32.mrf.mxu0  ;;  %v4474_v7 = vpop.f32.mrf.mxu1 }
 0x234   :  { %v4446_v53 = vpop.f32.mrf.mxu0  ;;  %v4476_v9 = vpop.f32.mrf.mxu1 }
 0x236   :  { %v1355_v54 = vpop.f32.mrf.mxu0  ;;  %v4478_v10 = vpop.f32.mrf.mxu1 }
 0x237   :  { %v1489_v40 = vadd.f32 %v1488_v48, %v1355_v54 }
 0x238   :  { %v1357_v57 = vpop.f32.mrf.mxu0  ;;  %v4480_v11 = vpop.f32.mrf.mxu1 }
 0x239   :  { %v1491_v44 = vadd.f32 %v1490_v37, %v1357_v57 }
 0x23a   :  { %v1359_v47 = vpop.f32.mrf.mxu0  ;;  %v1800_v15 = vpop.f32.mrf.mxu1 }
 0x23b   :  { %v1493_v55 = vadd.f32 %v1492_v56, %v1359_v47 }
 0x23c   :  { %v1361_v23 = vpop.f32.mrf.mxu0  ;;  %v1802_v16 = vpop.f32.mrf.mxu1 }
 0x23d   :  { %v1495_v62 = vadd.f32 %v1494_v26, %v1361_v23 }
 0x23e   :  { %v1804_v24 = vpop.f32.mrf.mxu1 }
 0x240   :  { %v1806_v61 = vpop.f32.mrf.mxu1 }
 0x24e   :  { %v4482_v12 = vpop.f32.mrf.mxu0 }
 0x250   :  { %v1632_v14 = vpop.f32.mrf.mxu0 }
 0x252   :  { %v4484_v3 = vpop.f32.mrf.mxu0  ;;  %v2014_v41 = vpop.f32.mrf.mxu1 }
 0x254   :  { %v4486_v8 = vpop.f32.mrf.mxu0  ;;  %v2016_v4 = vpop.f32.mrf.mxu1 }
 0x256   :  { %v1640_v17 = vpop.f32.mrf.mxu0  ;;  %v2018_v27 = vpop.f32.mrf.mxu1 }
 0x257   :  { %v1653_v13 = vadd.f32 %v1640_v17, %v1489_v40 }
 0x258   :  { %v1642_v18 = vpop.f32.mrf.mxu0  ;;  %v2020_v5 = vpop.f32.mrf.mxu1 }
 0x259   :  { %v1654_v20 = vadd.f32 %v1642_v18, %v1491_v44  ;;  %v1813_v21 = vadd.f32 %v1800_v15, %v1653_v13 }
 0x25a   :  { %v1644_v50 = vpop.f32.mrf.mxu0  ;;  %v4502_v39 = vpop.f32.mrf.mxu1 }
 0x25b   :  { %v1655_v6 = vadd.f32 %v1644_v50, %v1493_v55  ;;  %v1814_v43 = vadd.f32 %v1802_v16, %v1654_v20  ;;  %v1479_v50 = vadd.f32 %v4400_v52, %v4432_v33 }
 0x25c   :  { %v1646_v60 = vpop.f32.mrf.mxu0  ;;  %v4506_v40 = vpop.f32.mrf.mxu1 }
 0x25d   :  { %v1656_v2 = vadd.f32 %v1646_v60, %v1495_v62  ;;  %v1815_v19 = vadd.f32 %v1804_v24, %v1655_v6 }
 0x25e   :  { %v4508_v56 = vpop.f32.mrf.mxu1 }
 0x25f   :  { %v1816_v45 = vadd.f32 %v1806_v61, %v1656_v2  ;;  %v1485_v2 = vadd.f32 %v4430_v32, %v4446_v53 }
 0x260   :  { %v4510_v57 = vpop.f32.mrf.mxu1 }
 0x26e   :  { %v1949_v22 = vpop.f32.mrf.mxu0 }
 0x270   :  { %v1951_v25 = vpop.f32.mrf.mxu0 }
 0x272   :  { %v4488_v1 = vpop.f32.mrf.mxu0  ;;  %v2120_v44 = vpop.f32.mrf.mxu1 }
 0x274   :  { %v4490_v59 = vpop.f32.mrf.mxu0  ;;  %v2122_v51 = vpop.f32.mrf.mxu1 }
 0x276   :  { %v1959_v28 = vpop.f32.mrf.mxu0  ;;  %v2124_v47 = vpop.f32.mrf.mxu1 }
 0x277   :  { %v4492_v29 = vadd.f32 %v1959_v28, %v1813_v21  ;;  %v1481_v21 = vadd.f32 %v4410_v58, %v4434_v34  ;;  %v1652_v58 = vadd.f32 %v4486_v8, %v1485_v2 }
 0x278   :  { %v1961_v30 = vpop.f32.mrf.mxu0  ;;  %v2126_v26 = vpop.f32.mrf.mxu1 }
 0x279   :  { %v4494_v31 = vadd.f32 %v1961_v30, %v1814_v43  ;;  %v1650_v43 = vadd.f32 %v1632_v14, %v1481_v21  ;;  %v1483_v30 = vadd.f32 %v4420_v0, %v4444_v36  ;;  %v1812_v0 = vadd.f32 %v4480_v11, %v1652_v58 }
 0x27a   :  { %v1963_v48 = vpop.f32.mrf.mxu0  ;;  %v4512_v62 = vpop.f32.mrf.mxu1 }
 0x27b   :  { %v1978_v49 = vmax.f32 %v4492_v29, %v4494_v31  ;;  %v4498_v37 = vadd.f32 %v1963_v48, %v1815_v19  ;;  %v1649_v19 = vadd.f32 %v4482_v12, %v1479_v50  ;;  %v1810_v52 = vadd.f32 %v4476_v9, %v1650_v43 }
 0x27c   :  { %v1965_v35 = vpop.f32.mrf.mxu0  ;;  %v4514_v15 = vpop.f32.mrf.mxu1  ;;  %v1651_v48 = vadd.f32 %v4484_v3, %v1483_v30  ;;  %v1971_v3 = vadd.f32 %v4490_v59, %v1812_v0 }
 0x27d   :  { %v4500_v38 = vadd.f32 %v1965_v35, %v1816_v45  ;;  %v1809_v32 = vadd.f32 %v4474_v7, %v1649_v19  ;;  %v1969_v12 = vadd.f32 %v1951_v25, %v1810_v52  ;;  %v3803_v52 = vld [vmem:[%s4720_s5 + $0xb8] sm:$0xff]  }
 0x27e   :  { %v4518_v17 = vpop.f32.mrf.mxu1 }
 0x27f   :  { %v1979_v54 = vmax.f32 %v4498_v37, %v4500_v38  ;;  %v3815_v38 = vld [vmem:[%s4720_s5 + $0x88] sm:$0xff]  }
 0x280   :  { %v4522_v18 = vpop.f32.mrf.mxu1 }
 0x28e   :  { %v2067_v42 = vpop.f32.mrf.mxu0 }
 0x28f   :  { %v2068_v24 = vadd.f32 %v2067_v42, %v2014_v41 }
 0x290   :  { %v2069_v55 = vpop.f32.mrf.mxu0 }
 0x291   :  { %v2070_v60 = vadd.f32 %v2069_v55, %v2016_v4  ;;  %v2139_v28 = vadd.f32 %v2120_v44, %v2068_v24  ;;  %v1968_v44 = vadd.f32 %v1949_v22, %v1809_v32  ;;  %v4545_v22 = vld [vmem:[%s4719_s4] ss:$0 sm:$0xff] }
 0x292   :  { %v2071_v23 = vpop.f32.mrf.mxu0  ;;  %v2243_v6 = vpop.f32.mrf.mxu1 }
 0x293   :  { %v2072_v45 = vadd.f32 %v2071_v23, %v2018_v27  ;;  %v2140_v4 = vadd.f32 %v2122_v51, %v2070_v60 }
 0x294   :  { %v2073_v63 = vpop.f32.mrf.mxu0  ;;  %v2245_v34 = vpop.f32.mrf.mxu1 }
 0x295   :  { %v2074_v33 = vadd.f32 %v2073_v63, %v2020_v5  ;;  %v2141_v35 = vadd.f32 %v2124_v47, %v2072_v45  ;;  %v1811_v5 = vadd.f32 %v4478_v10, %v1651_v48  ;;  %v1976_v63 = vmax.f32 %v1968_v44, %v1969_v12  ;;  %v3802_v45 = vld [vmem:[%s4720_s5 + $0xf8] sm:$0xff]  }
 0x296   :  { %v4516_v16 = vpop.f32.mrf.mxu0  ;;  %v2247_v36 = vpop.f32.mrf.mxu1 }
 0x297   :  { %v2142_v9 = vadd.f32 %v2126_v26, %v2074_v33  ;;  %v1970_v47 = vadd.f32 %v4488_v1, %v1811_v5  ;;  %v3804_v33 = vld [vmem:[%s4720_s5 + $0xf0] sm:$0xff]  }
 0x298   :  { %v4520_v13 = vpop.f32.mrf.mxu0  ;;  %v2249_v25 = vpop.f32.mrf.mxu1 }
 0x29a   :  { %v4524_v20 = vpop.f32.mrf.mxu0  ;;  %v2253_v19 = vpop.f32.mrf.mxu1 }
 0x29c   :  { %v2083_v61 = vpop.f32.mrf.mxu0 }
 0x29d   :  { %v2084_v1 = vadd.f32 %v2083_v61, %v4510_v57  ;;  %v2080_v61 = vadd.f32 %v4520_v13, %v4506_v40 }
 0x29f   :  { %v2146_v48 = vadd.f32 %v4522_v18, %v2084_v1  ;;  %v2144_v13 = vadd.f32 %v4514_v15, %v2080_v61 }
 0x2ae   :  { %v2181_v41 = vpop.f32.mrf.mxu0 }
 0x2af   :  { %v2200_v14 = vadd.f32 %v2181_v41, %v2139_v28  ;;  %v2255_v41 = vpop.f32.mrf.mxu1 }
 0x2b0   :  { %v2183_v53 = vpop.f32.mrf.mxu0 }
 0x2b1   :  { %v2201_v27 = vadd.f32 %v2183_v53, %v2140_v4  ;;  %v2262_v42 = vadd.f32 %v2243_v6, %v2200_v14  ;;  %v1977_v6 = vmax.f32 %v1970_v47, %v1971_v3  ;;  %v2082_v14 = vadd.f32 %v4524_v20, %v4508_v56  ;;  %v2257_v32 = vpop.f32.mrf.mxu1  ;;  %v3805_v53 = vld [vmem:[%s4720_s5 + $0xb0] sm:$0xff]   ;;  %v3806_v56 = vld [vmem:[%s4720_s5 + $0xe8] sm:$0xff]  }
 0x2b2   :  { %v2185_v8 = vpop.f32.mrf.mxu0  ;;  %v2078_v20 = vadd.f32 %v4516_v16, %v4502_v39  ;;  %v3807_v39 = vld [vmem:[%s4720_s5 + $0xa8] sm:$0xff]   ;;  %v3808_v16 = vld [vmem:[%s4720_s5 + $0xe0] sm:$0xff]   ;;  %v3819_v47 = vld [vmem:[%s4722_s7 + $0x30] sm:$0xff]  }
 0x2b3   :  { %v2263_v55 = vadd.f32 %v2245_v34, %v2201_v27  ;;  %v2202_v23 = vadd.f32 %v2185_v8, %v2141_v35  ;;  %v2145_v12 = vadd.f32 %v4518_v17, %v2082_v14  ;;  %v2259_v27 = vpop.f32.mrf.mxu1  ;;  %v3810_v8 = vld [vmem:[%s4720_s5 + $0xd8] sm:$0xff]   ;;  %v3814_v3 = vld [vmem:[%s4720_s5 + $0xc8] sm:$0xff]  }
 0x2b4   :  { %v2187_v51 = vpop.f32.mrf.mxu0  ;;  %v2143_v17 = vadd.f32 %v4512_v62, %v2078_v20 }
 0x2b5   :  { %v2270_v7 = vmax.f32 %v2262_v42, %v2263_v55  ;;  %v2203_v21 = vadd.f32 %v2187_v51, %v2142_v9  ;;  %v2264_v50 = vadd.f32 %v2247_v36, %v2202_v23  ;;  %v3809_v36 = vld [vmem:[%s4720_s5 + $0xa0] sm:$0xff]   ;;  %v3811_v23 = vld [vmem:[%s4720_s5 + $0x98] sm:$0xff]   ;;  %v3812_v9 = vld [vmem:[%s4720_s5 + $0xd0] sm:$0xff]  }
 0x2b6   :  { %v2191_v11 = vpop.f32.mrf.mxu0 }
 0x2b7   :  { %v2274_v24 = vmax.f32 %v1976_v63, %v2270_v7  ;;  %v2265_v26 = vadd.f32 %v2249_v25, %v2203_v21  ;;  %v2204_v15 = vadd.f32 %v2191_v11, %v2143_v17  ;;  %v3813_v63 = vld [vmem:[%s4720_s5 + $0x90] sm:$0xff]   ;;  %v3832_v17 = vld [vmem:[%s4724_s9 + $0x8] sm:$0xff]  }
 0x2b8   :  { %v2193_v60 = vpop.f32.mrf.mxu0 }
 0x2b9   :  { %v2284_v10 = vadd.f32 %v4545_v22, %v2274_v24  ;;  %v2271_v43 = vmax.f32 %v2264_v50, %v2265_v26  ;;  %v2205_v35 = vadd.f32 %v2193_v60, %v2144_v13  ;;  %v2266_v55 = vadd.f32 %v2253_v19, %v2204_v15  ;;  %v3820_v24 = vld [vmem:[%s4722_s7 + $0x28] sm:$0xff]   ;;  %v3821_v50 = vld [vmem:[%s4722_s7 + $0x20] sm:$0xff]   ;;  %v3822_v26 = vld [vmem:[%s4722_s7 + $0x18] sm:$0xff]  }
 0x2ba   :  { %v2195_v58 = vpop.f32.mrf.mxu0  ;;  %v3826_v60 = vld [vmem:[%s4724_s9 + $0x38] sm:$0xff]   ;;  %v3829_v19 = vld [vmem:[%s4724_s9 + $0x20] sm:$0xff]  }
 0x2bb   :  { %v2288_v59 = vmax.f32 %v2284_v10, 0.0  ;;  %v2275_v2 = vmax.f32 %v1977_v6, %v2271_v43  ;;  %v2206_v18 = vadd.f32 %v2195_v58, %v2145_v12  ;;  %v2267_v42 = vadd.f32 %v2255_v41, %v2205_v35  ;;  %v3823_v6 = vld [vmem:[%s4722_s7 + $0x10] sm:$0xff]   ;;  %v3824_v10 = vld [vmem:[%s4722_s7 + $0x8] sm:$0xff]   ;;  %v3825_v43 = vld [vmem:[%s4722_s7] sm:$0xff]  }
 0x2bc   :  { %v2197_v57 = vpop.f32.mrf.mxu0  ;;  %v3833_v35 = vld [vmem:[%s4724_s9] sm:$0xff]  }
 0x2bd   :  { %v2297_v28 = vpack.c.bf16 %v2288_v59, %v2288_v59  ;;  %v2285_v30 = vadd.f32 %v4545_v22, %v2275_v2  ;;  %v2207_v40 = vadd.f32 %v2197_v57, %v2146_v48  ;;  %v2268_v0 = vadd.f32 %v2257_v32, %v2206_v18  ;;  %v3827_v59 = vld [vmem:[%s4724_s9 + $0x30] sm:$0xff]   ;;  %v3828_v2 = vld [vmem:[%s4724_s9 + $0x28] sm:$0xff]  }
 0x2be   :  { %v2272_v5 = vmax.f32 %v2266_v55, %v2267_v42 }
 0x2bf   :  { %v2289_v34 = vmax.f32 %v2285_v30, 0.0  ;;  %3375 = vmatmul.mubr.bf16.vlgmr.msra.gmra.mxu1 %v2297_v28  ;;  %v2269_v44 = vadd.f32 %v2259_v27, %v2207_v40  ;;  %v3831_v28 = vld [vmem:[%s4724_s9 + $0x10] sm:$0xff]  }
 0x2c0   :  { %3399 = vmatpush3.bf16.msra.mxu1 %v3802_v45  ;;  %3414 = vmatprep.mubr.msk.bf16.mxu1 %vm3884_vm0, %v3883_v46  ;;  %v2276_v7 = vmax.f32 %v1978_v49, %v2272_v5  ;;  %v3817_v49 = vld [vmem:[%s4720_s5 + $0x80] sm:$0xff]   ;;  %v3830_v45 = vld [vmem:[%s4724_s9 + $0x18] sm:$0xff]  }
 0x2c1   :  { %v2316_v4 = vpack.c.bf16 %v2289_v34, %v2289_v34  ;;  %3400 = vmatprep.subr.bf16.mxu1 %v3883_v46  ;;  %v2273_v62 = vmax.f32 %v2268_v0, %v2269_v44  ;;  %v3266_v44 = vld [vmem:[%s4723_s8] ss:$0 sm:$0xff] }
 0x2c2   :  { %v2286_v31 = vadd.f32 %v4545_v22, %v2276_v7 }
 0x2c3   :  { %3355 = vmatmul.mubr.bf16.vlgmr.msra.gmra.mxu0 %v2316_v4  ;;  %v2277_v51 = vmax.f32 %v1979_v54, %v2273_v62  ;;  %v3816_v54 = vld [vmem:[%s4720_s5 + $0xc0] sm:$0xff]  }
 0x2c4   :  { %3379 = vmatpush3.bf16.msra.mxu0 %v3803_v52  ;;  %3401 = vmatpush3.bf16.msra.mxu1 %v3804_v33  ;;  %v2290_v25 = vmax.f32 %v2286_v31, 0.0 }
 0x2c5   :  { %3380 = vmatprep.subr.bf16.mxu0 %v3883_v46  ;;  %3402 = vmatprep.subr.bf16.mxu1 %v3883_v46  ;;  %v2287_v37 = vadd.f32 %v4545_v22, %v2277_v51  ;;  %v3818_v22 = vld [vmem:[%s4722_s7 + $0x38] sm:$0xff]  }
 0x2c6   :  { %3394 = vmatprep.mubr.msk.bf16.mxu0 %vm3884_vm0, %v3883_v46  ;;  %v2512_v11 = vpack.c.bf16 %v2290_v25, %v2290_v25 }
 0x2c7   :  { %v2291_v29 = vmax.f32 %v2287_v37, 0.0 }
 0x2c8   :  { %3381 = vmatpush3.bf16.msra.mxu0 %v3805_v53  ;;  %3403 = vmatpush3.bf16.msra.mxu1 %v3806_v56  ;;  %v3265_v56 = vld [vmem:[%s4721_s6] ss:$0 sm:$0xff] }
 0x2c9   :  { %3382 = vmatprep.subr.bf16.mxu0 %v3883_v46  ;;  %3404 = vmatprep.subr.bf16.mxu1 %v3883_v46  ;;  %v2621_v21 = vpack.c.bf16 %v2291_v29, %v2291_v29 }
 0x2cc   :  { %3383 = vmatpush3.bf16.msra.mxu0 %v3807_v39  ;;  %3405 = vmatpush3.bf16.msra.mxu1 %v3808_v16 }
 0x2cd   :  { %3384 = vmatprep.subr.bf16.mxu0 %v3883_v46  ;;  %3406 = vmatprep.subr.bf16.mxu1 %v3883_v46 }
 0x2d0   :  { %3385 = vmatpush3.bf16.msra.mxu0 %v3809_v36  ;;  %3407 = vmatpush3.bf16.msra.mxu1 %v3810_v8 }
 0x2d1   :  { %3386 = vmatprep.subr.bf16.mxu0 %v3883_v46  ;;  %3408 = vmatprep.subr.bf16.mxu1 %v3883_v46 }
 0x2d4   :  { %3387 = vmatpush3.bf16.msra.mxu0 %v3811_v23  ;;  %3409 = vmatpush3.bf16.msra.mxu1 %v3812_v9 }
 0x2d5   :  { %3388 = vmatprep.subr.bf16.mxu0 %v3883_v46  ;;  %3410 = vmatprep.subr.bf16.mxu1 %v3883_v46 }
 0x2d8   :  { %3389 = vmatpush3.bf16.msra.mxu0 %v3813_v63  ;;  %3411 = vmatpush3.bf16.msra.mxu1 %v3814_v3 }
 0x2d9   :  { %3390 = vmatprep.subr.bf16.mxu0 %v3883_v46  ;;  %3412 = vmatprep.subr.bf16.mxu1 %v3883_v46 }
 0x2dc   :  { %3391 = vmatpush3.bf16.msra.mxu0 %v3815_v38  ;;  %3413 = vmatpush3.bf16.msra.mxu1 %v3816_v54 }
 0x2dd   :  { %3392 = vmatprep.subr.bf16.mxu0 %v3883_v46  ;;  %3438 = vmatprep.subr.bf16.mxu1 %v3883_v46 }
 0x2df   :  { %3415 = vmatmul.mubr.bf16.vlgmr.msra.gmra.mxu1 %v2621_v21 }
 0x2e0   :  { %3393 = vmatpush3.bf16.msra.mxu0 %v3817_v49  ;;  %3454 = vmatprep.mubr.msk.bf16.mxu1 %vm3884_vm0, %v3883_v46 }
 0x2e1   :  { %3418 = vmatprep.subr.bf16.mxu0 %v3883_v46  ;;  %3439 = vmatpush3.bf16.msra.mxu1 %v3826_v60 }
 0x2e2   :  { %3440 = vmatprep.subr.bf16.mxu1 %v3883_v46 }
 0x2e3   :  { %3395 = vmatmul.mubr.bf16.vlgmr.msra.gmra.mxu0 %v2512_v11 }
 0x2e4   :  { %3434 = vmatprep.mubr.msk.bf16.mxu0 %vm3884_vm0, %v3883_v46  ;;  %3419 = vmatpush3.bf16.msra.mxu0 %v3818_v22 }
 0x2e5   :  { %3420 = vmatprep.subr.bf16.mxu0 %v3883_v46  ;;  %3441 = vmatpush3.bf16.msra.mxu1 %v3827_v59 }
 0x2e6   :  { %3442 = vmatprep.subr.bf16.mxu1 %v3883_v46 }
 0x2e8   :  { %3421 = vmatpush3.bf16.msra.mxu0 %v3819_v47 }
 0x2e9   :  { %3422 = vmatprep.subr.bf16.mxu0 %v3883_v46  ;;  %3443 = vmatpush3.bf16.msra.mxu1 %v3828_v2 }
 0x2ea   :  { %3444 = vmatprep.subr.bf16.mxu1 %v3883_v46 }
 0x2ec   :  { %3423 = vmatpush3.bf16.msra.mxu0 %v3820_v24 }
 0x2ed   :  { %3424 = vmatprep.subr.bf16.mxu0 %v3883_v46  ;;  %3445 = vmatpush3.bf16.msra.mxu1 %v3829_v19 }
 0x2ee   :  { %3446 = vmatprep.subr.bf16.mxu1 %v3883_v46 }
 0x2f0   :  { %3425 = vmatpush3.bf16.msra.mxu0 %v3821_v50 }
 0x2f1   :  { %3426 = vmatprep.subr.bf16.mxu0 %v3883_v46  ;;  %3447 = vmatpush3.bf16.msra.mxu1 %v3830_v45 }
 0x2f2   :  { %3448 = vmatprep.subr.bf16.mxu1 %v3883_v46 }
 0x2f4   :  { %3427 = vmatpush3.bf16.msra.mxu0 %v3822_v26 }
 0x2f5   :  { %3428 = vmatprep.subr.bf16.mxu0 %v3883_v46  ;;  %3449 = vmatpush3.bf16.msra.mxu1 %v3831_v28 }
 0x2f6   :  { %3450 = vmatprep.subr.bf16.mxu1 %v3883_v46 }
 0x2f8   :  { %3429 = vmatpush3.bf16.msra.mxu0 %v3823_v6 }
 0x2f9   :  { %3430 = vmatprep.subr.bf16.mxu0 %v3883_v46  ;;  %3451 = vmatpush3.bf16.msra.mxu1 %v3832_v17 }
 0x2fa   :  { %3452 = vmatprep.subr.bf16.mxu1 %v3883_v46 }
 0x2fc   :  { %3431 = vmatpush3.bf16.msra.mxu0 %v3824_v10 }
 0x2fd   :  { %3432 = vmatprep.subr.bf16.mxu0 %v3883_v46  ;;  %3453 = vmatpush3.bf16.msra.mxu1 %v3833_v35  ;;  %v3275_v46 = vld [vmem:[%s4725_s10] ss:$0 sm:$0xff] }
 0x300   :  { %3433 = vmatpush3.bf16.msra.mxu0 %v3825_v43 }
 0x37f   :  { %v2504_v30 = vpop.f32.mrf.mxu1 }
 0x381   :  { %v3376_v58 = vpop.f32.mrf.mxu1 }
 0x383   :  { %v2416_v1 = vpop.f32.mrf.mxu0  ;;  %v2507_v34 = vpop.f32.mrf.mxu1 }
 0x384   :  { %v2505_v61 = vadd.f32 %v2504_v30, %v2416_v1 }
 0x385   :  { %v3356_v41 = vpop.f32.mrf.mxu0  ;;  %v3377_v52 = vpop.f32.mrf.mxu1 }
 0x387   :  { %v2419_v33 = vpop.f32.mrf.mxu0 }
 0x389   :  { %v3357_v14 = vpop.f32.mrf.mxu0 }
 0x39f   :  { %v2721_v4 = vpop.f32.mrf.mxu1 }
 0x3a1   :  { %v3416_v57 = vpop.f32.mrf.mxu1 }
 0x3a3   :  { %v2612_v48 = vpop.f32.mrf.mxu0  ;;  %v2724_v32 = vpop.f32.mrf.mxu1 }
 0x3a4   :  { %v2618_v53 = vadd.f32 %v2612_v48, %v2505_v61 }
 0x3a5   :  { %v3396_v20 = vpop.f32.mrf.mxu0  ;;  %v3417_v12 = vpop.f32.mrf.mxu1 }
 0x3a6   :  { %v2727_v40 = vadd.f32 %v2721_v4, %v2618_v53 }
 0x3a7   :  { %v2615_v13 = vpop.f32.mrf.mxu0 }
 0x3a8   :  { %v2735_v18 = vadd.f32 %v3265_v56, %v2727_v40 }
 0x3a9   :  { %v3397_v27 = vpop.f32.mrf.mxu0 }
 0x3aa   :  { %v2736_v39 = vmax.f32 %v2735_v18, 0.0 }
 0x3ac   :  { %v2737_v16 = vpack.c.bf16 %v2736_v39, %v2736_v39 }
 0x3ae   :  { %3435 = vmatmul.mubr.bf16.vlgmr.msra.gmra.mxu0 %v2737_v16 }
 0x46e   :  { %v2843_v15 = vpop.f32.mrf.mxu0 }
 0x46f   :  { %v2844_v0 = vadd.f32 %v3266_v44, %v2843_v15 }
 0x470   :  { %v3436_v36 = vpop.f32.mrf.mxu0 }
 0x471   :  { %v2849_v8 = vmax.f32 %v2844_v0, 0.0 }
 0x472   :  { %v2846_v42 = vpop.f32.mrf.mxu0 }
 0x473   :  { %v2850_v62 = vpack.c.bf16 %v2849_v8, %v2849_v8 }
 0x474   :  { %v3437_v55 = vpop.f32.mrf.mxu0 }
 0x475   :  { %3455 = vmatmul.mubr.bf16.vlgmr.msra.gmra.mxu1 %v2850_v62 }
 0x535   :  { %v2956_v23 = vpop.f32.mrf.mxu1 }
 0x536   :  { %v2957_v9 = vadd.f32 %v3275_v46, %v2956_v23 }
 0x537   :  { %v3456_v5 = vpop.f32.mrf.mxu1 }
 0x538   :  { %2962 = vst [vmem:[%s4726_s11] sm:$0xff] %v2957_v9 }
 0x539   :  { %v2959_v51 = vpop.f32.mrf.mxu1 }
 0x53b   :  { %v3457_v63 = vpop.f32.mrf.mxu1 }
 0x53c   :  { %2967 = vsyncpa [#allocation4], 1 }
 0x53d   :  { %2968 = vsyncpa [#allocation6], 1 }

</bundles_post_ra>
